<compile_context>
chip_gen: v7x
topology: tpu7x:2x2x1
jax: 0.10.0
libtpu: 0.0.40
codegen_flags: <defaults>
</compile_context>

<pallas_src>
import jax
import jax.numpy as jnp
from jax.experimental import pallas as pl
from jax.experimental.pallas import tpu as pltpu


def _round_up(x, m):
    return ((x + m - 1) // m) * m


# ---------------------------------------------------------------------------
# Kernel 1: LSTM recurrence (hidden states only; FC hoisted out).
# ---------------------------------------------------------------------------
def _lstm_chunk_kernel(x_ref, w_ref, b_ref, h_out_ref, h_sc, c_sc):
    """One grid step = T_CHUNK LSTM timesteps.

    x_ref:     (T_CHUNK, B, E)   bf16 embedded inputs (time-major)
    w_ref:     (E + H, 4H)       bf16 fused [W_ih^T ; W_hh^T]
    b_ref:     (1, 4H)           f32  b_ih + b_hh
    h_out_ref: (T_CHUNK, B, H)   bf16 hidden states for this chunk
    h_sc/c_sc: (B, H)            f32  persistent LSTM state (VMEM scratch)
    """
    @pl.when(pl.program_id(0) == 0)
    def _():
        h_sc[...] = jnp.zeros_like(h_sc)
        c_sc[...] = jnp.zeros_like(c_sc)

    hdim = h_sc.shape[1]
    w = w_ref[...]          # hoisted: constant across the inner time loop
    b = b_ref[...]

    def step(t, carry):
        del carry
        x = x_ref[t]                                   # (B, E) bf16
        h_prev = h_sc[...]
        c_prev = c_sc[...]
        # One fused gate matmul: (B, E+H) @ (E+H, 4H), f32 accumulation.
        xh = jnp.concatenate([x, h_prev.astype(x.dtype)], axis=1)
        gates = jnp.dot(xh, w, preferred_element_type=jnp.float32) + b
        # PyTorch gate order [i, f, g, o]; slices are lane-aligned (H % 128 == 0).
        i_g = jax.nn.sigmoid(gates[:, 0 * hdim:1 * hdim])
        f_g = jax.nn.sigmoid(gates[:, 1 * hdim:2 * hdim])
        g_g = jnp.tanh(gates[:, 2 * hdim:3 * hdim])
        o_g = jax.nn.sigmoid(gates[:, 3 * hdim:4 * hdim])
        c_new = f_g * c_prev + i_g * g_g
        h_new = o_g * jnp.tanh(c_new)
        c_sc[...] = c_new
        h_sc[...] = h_new
        h_out_ref[t] = h_new.astype(h_out_ref.dtype)
        return 0

    jax.lax.fori_loop(0, x_ref.shape[0], step, 0, unroll=True)


# ---------------------------------------------------------------------------
# Kernel 2: batched FC projection over the whole (B*T, H) hidden-state slab.
# ---------------------------------------------------------------------------
def _fc_kernel(h_ref, w_ref, b_ref, o_ref):
    o_ref[...] = (
        jnp.dot(h_ref[...], w_ref[...], preferred_element_type=jnp.float32)
        + b_ref[...]
    ).astype(o_ref.dtype)


# ---------------------------------------------------------------------------
# Wrapper mirroring DecoderRNN.forward (batch_first in / batch_first out).
# ---------------------------------------------------------------------------
def decoder_rnn_forward(features, captions, params, *, t_chunk=8):
    emb_w = params["emb_w"]          # (V, E)
    w_ih = params["w_ih"]            # (4H, E)   PyTorch LSTM layout
    w_hh = params["w_hh"]            # (4H, H)
    b_ih = params["b_ih"]            # (4H,)
    b_hh = params["b_hh"]            # (4H,)
    fc_w = params["fc_w"]            # (V, H)
    fc_b = params["fc_b"]            # (V,)

    B, E = features.shape
    V, H = fc_w.shape

    # Hardware-friendly padded dims.
    B_pad = _round_up(B, 8)
    E_pad = _round_up(E, 128)
    H_pad = _round_up(H, 128)
    V_pad = _round_up(V, 128)

    # ---- Embedding lookup + feature concat (XLA glue), built TIME-MAJOR ----
    emb_w_p = jnp.zeros((emb_w.shape[0], E_pad), jnp.bfloat16)
    emb_w_p = emb_w_p.at[:, :E].set(emb_w.astype(jnp.bfloat16))
    feats_p = jnp.zeros((B, E_pad), jnp.bfloat16)
    feats_p = feats_p.at[:, :E].set(features.astype(jnp.bfloat16))

    cap_tm = jnp.transpose(captions[:, :-1])               # (L-1, B) tiny int transpose
    cap_emb = jnp.take(emb_w_p, cap_tm, axis=0)            # (L-1, B, E_pad) time-major
    inputs_tm = jnp.concatenate([feats_p[None], cap_emb], axis=0)   # (T, B, E_pad)
    T = inputs_tm.shape[0]

    t_chunk = max(1, min(t_chunk, T))
    T_pad = _round_up(T, t_chunk)
    inputs_tm = jnp.pad(inputs_tm, ((0, T_pad - T), (0, B_pad - B), (0, 0)))

    # ---- Fused, per-gate-padded LSTM weights: (E_pad + H_pad, 4 * H_pad) ----
    def _pad_gate_rows(w_4h_x):      # (4H, X) -> (4*H_pad, X), zero pad per gate
        w4 = w_4h_x.reshape(4, H, -1)
        w4 = jnp.pad(w4, ((0, 0), (0, H_pad - H), (0, 0)))
        return w4.reshape(4 * H_pad, -1)

    w_ih_p = jnp.pad(_pad_gate_rows(w_ih), ((0, 0), (0, E_pad - E)))   # (4*H_pad, E_pad)
    w_hh_p = jnp.pad(_pad_gate_rows(w_hh), ((0, 0), (0, H_pad - H)))   # (4*H_pad, H_pad)
    w_cat = jnp.concatenate([w_ih_p.T, w_hh_p.T], axis=0).astype(jnp.bfloat16)

    bias = (b_ih + b_hh).reshape(4, H)
    bias = jnp.pad(bias, ((0, 0), (0, H_pad - H)))
    bias = bias.reshape(1, 4 * H_pad).astype(jnp.float32)

    # ---- FC weights (padded, transposed) ----
    fcw_p = jnp.zeros((H_pad, V_pad), jnp.bfloat16)
    fcw_p = fcw_p.at[:H, :V].set(jnp.transpose(fc_w).astype(jnp.bfloat16))
    fcb_p = jnp.zeros((1, V_pad), jnp.float32).at[0, :V].set(fc_b.astype(jnp.float32))

    # ---- Kernel 1: recurrence, chunked over time ----
    n_chunks = T_pad // t_chunk
    cost = pl.CostEstimate(
        flops=int(2 * T_pad * B_pad * (E_pad + H_pad) * 4 * H_pad),
        transcendentals=int(5 * T_pad * B_pad * H_pad),
        bytes_accessed=int(inputs_tm.size * 2 + w_cat.size * 2 + bias.size * 4
                           + T_pad * B_pad * H_pad * 2),
    )
    # NOTE: weight BlockSpecs have constant block indices, so they are fetched
    # once; default VMEM limits are ample at these (and bf16) sizes.
    h_states = pl.pallas_call(
        _lstm_chunk_kernel,
        out_shape=jax.ShapeDtypeStruct((T_pad, B_pad, H_pad), jnp.bfloat16),
        grid_spec=pltpu.PrefetchScalarGridSpec(
            num_scalar_prefetch=0,
            grid=(n_chunks,),
            in_specs=[
                pl.BlockSpec((t_chunk, B_pad, E_pad), lambda t: (t, 0, 0)),
                pl.BlockSpec((E_pad + H_pad, 4 * H_pad), lambda t: (0, 0)),
                pl.BlockSpec((1, 4 * H_pad), lambda t: (0, 0)),
            ],
            out_specs=pl.BlockSpec((t_chunk, B_pad, H_pad), lambda t: (t, 0, 0)),
            scratch_shapes=[
                pltpu.VMEM((B_pad, H_pad), jnp.float32),   # h state
                pltpu.VMEM((B_pad, H_pad), jnp.float32),   # c state
            ],
        ),
        compiler_params=pltpu.CompilerParams(
            dimension_semantics=("arbitrary",)),           # sequential recurrence
        cost_estimate=cost,
    )(inputs_tm, w_cat, bias)

    # ---- Kernel 2: hoisted FC over the whole hidden-state slab ----
    # Transpose the SMALL hidden tensor (H, not V, per element) so the logits
    # come out batch-first with no output transpose.
    h_bt = jnp.transpose(h_states, (1, 0, 2)).reshape(B_pad * T_pad, H_pad)
    M = B_pad * T_pad
    if M <= 512:
        tm, M_pad = M, M
    else:
        tm = 512 if M % 512 == 0 else (256 if M % 256 == 0 else 128)
        M_pad = _round_up(M, tm)
    if M_pad > M:
        h_bt = jnp.pad(h_bt, ((0, M_pad - M), (0, 0)))
    if V_pad <= 512:
        tn = V_pad
    else:
        tn = 512 if V_pad % 512 == 0 else (256 if V_pad % 256 == 0 else 128)

    logits = pl.pallas_call(
        _fc_kernel,
        out_shape=jax.ShapeDtypeStruct((M_pad, V_pad), jnp.float32),
        grid_spec=pltpu.PrefetchScalarGridSpec(
            num_scalar_prefetch=0,
            grid=(M_pad // tm, V_pad // tn),
            in_specs=[
                pl.BlockSpec((tm, H_pad), lambda i, j: (i, 0)),
                pl.BlockSpec((H_pad, tn), lambda i, j: (0, j)),
                pl.BlockSpec((1, tn), lambda i, j: (0, j)),
            ],
            out_specs=pl.BlockSpec((tm, tn), lambda i, j: (i, j)),
        ),
        compiler_params=pltpu.CompilerParams(
            dimension_semantics=("parallel", "parallel")),
    )(h_bt, fcw_p, fcb_p)

    logits = logits[:M].reshape(B_pad, T_pad, V_pad)
    return logits[:B, :T, :V]                              # (B, T, V) batch_first


# ---------------------------------------------------------------------------
# Pure-JAX reference (mirrors PyTorch semantics) + init.
# ---------------------------------------------------------------------------
def _decoder_ref(features, captions, params):
    emb_w, w_ih, w_hh, b_ih, b_hh, fc_w, fc_b = (
        params[k] for k in ("emb_w", "w_ih", "w_hh", "b_ih", "b_hh", "fc_w", "fc_b"))
    B, _ = features.shape
    H = w_hh.shape[1]
    cap_emb = jnp.take(emb_w, captions[:, :-1], axis=0)
    inputs = jnp.concatenate([features[:, None, :], cap_emb], axis=1)
    T = inputs.shape[1]
    h = jnp.zeros((B, H), jnp.float32)
    c = jnp.zeros((B, H), jnp.float32)
    outs = []
    for t in range(T):
        g = inputs[:, t] @ w_ih.T + h @ w_hh.T + b_ih + b_hh
        i_g = jax.nn.sigmoid(g[:, :H])
        f_g = jax.nn.sigmoid(g[:, H:2 * H])
        g_g = jnp.tanh(g[:, 2 * H:3 * H])
        o_g = jax.nn.sigmoid(g[:, 3 * H:])
        c = f_g * c + i_g * g_g
        h = o_g * jnp.tanh(c)
        outs.append(h @ fc_w.T + fc_b)
    return jnp.stack(outs, axis=1)


def init_params(key, embed_size, hidden_size, vocab_size):
    k_emb, k_wih, k_whh, k_bih, k_bhh, k_fcw, k_fcb = jax.random.split(key, 7)

    def xavier_normal(k, shape):
        fan_out, fan_in = shape
        std = (2.0 / (fan_in + fan_out)) ** 0.5
        return std * jax.random.normal(k, shape, dtype=jnp.float32)

    bound = 1.0 / (hidden_size ** 0.5)   # PyTorch default LSTM init range
    u = lambda k, shape: jax.random.uniform(k, shape, jnp.float32, -bound, bound)

    return {
        "emb_w": xavier_normal(k_emb, (vocab_size, embed_size)),
        "w_ih": u(k_wih, (4 * hidden_size, embed_size)),
        "w_hh": u(k_whh, (4 * hidden_size, hidden_size)),
        "b_ih": u(k_bih, (4 * hidden_size,)),
        "b_hh": u(k_bhh, (4 * hidden_size,)),
        "fc_w": xavier_normal(k_fcw, (vocab_size, hidden_size)),
        "fc_b": u(k_fcb, (vocab_size,)),
    }


if __name__ == "__main__":
    # TODO(synk): DecoderRNN.sample (greedy decode loop) is not implemented here.
    embed_size, hidden_size, vocab_size = 32, 32, 64
    batch, seq_len = 2, 8     # captions length 8 -> 7 tokens + 1 feature step = T=8

    key = jax.random.PRNGKey(0)
    k_p, k_feat, k_cap = jax.random.split(key, 3)

    params = init_params(k_p, embed_size, hidden_size, vocab_size)
    features = jax.random.normal(k_feat, (batch, embed_size), dtype=jnp.float32)
    captions = jax.random.randint(k_cap, (batch, seq_len), 0, vocab_size, dtype=jnp.int32)

    out = decoder_rnn_forward(features, captions, params)
    out = jax.block_until_ready(out)
    assert out.shape == (batch, seq_len, vocab_size), out.shape

    ref = jax.block_until_ready(_decoder_ref(features, captions, params))
    max_err = float(jnp.max(jnp.abs(out - ref)))
    assert max_err < 5e-2, f"max abs err vs reference: {max_err}"

    print("KERNEL_OK")
</pallas_src>

<mosaic_0001>
module attributes {stable_mosaic.version = 11 : i64} {
  func.func @_lstm_chunk_kernel(%arg0: i32, %arg1: memref<8x8x128xbf16, #tpu.memory_space<vmem>>, %arg2: memref<256x512xbf16, #tpu.memory_space<vmem>>, %arg3: memref<1x512xf32, #tpu.memory_space<vmem>>, %arg4: memref<8x8x128xbf16, #tpu.memory_space<vmem>>, %arg5: memref<8x128xf32, #tpu.memory_space<vmem>>, %arg6: memref<8x128xf32, #tpu.memory_space<vmem>>) attributes {dimension_semantics = [#tpu.dimension_semantics<arbitrary>], iteration_bounds = array<i64: 1>, scalar_prefetch = 0 : i64, scratch_operands = 2 : i64, tpu.core_type = #tpu.core_type<tc>, window_params = [{transform_indices = @transform_0, window_bounds = array<i64: 8, 8, 128>}, {pipeline_mode = #tpu.pipeline_mode<synchronous>, transform_indices = @transform_1, window_bounds = array<i64: 256, 512>}, {pipeline_mode = #tpu.pipeline_mode<synchronous>, transform_indices = @transform_2, window_bounds = array<i64: 1, 512>}, {transform_indices = @transform_3, window_bounds = array<i64: 8, 8, 128>}]} {
    %c0_i32 = arith.constant 0 : i32
    %0 = arith.cmpi eq, %arg0, %c0_i32 : i32
    %1 = arith.extui %0 : i1 to i32
    %c0_i32_0 = arith.constant 0 : i32
    %2 = arith.cmpi ne, %1, %c0_i32_0 : i32
    scf.if %2 {
      %cst_132 = arith.constant 0.000000e+00 : f32
      %341 = vector.broadcast %cst_132 : f32 to vector<8x128xf32>
      %c0_133 = arith.constant 0 : index
      %c0_134 = arith.constant 0 : index
      %342 = vector.load %arg5[%c0_133, %c0_134] : memref<8x128xf32, #tpu.memory_space<vmem>>, vector<8x128xf32>
      tpu.vector_store %arg5[%c0_133, %c0_134], %341 {strides = array<i32>} : memref<8x128xf32, #tpu.memory_space<vmem>>, vector<8x128xf32>,
      %cst_135 = arith.constant 0.000000e+00 : f32
      %343 = vector.broadcast %cst_135 : f32 to vector<8x128xf32>
      %c0_136 = arith.constant 0 : index
      %c0_137 = arith.constant 0 : index
      %344 = vector.load %arg6[%c0_136, %c0_137] : memref<8x128xf32, #tpu.memory_space<vmem>>, vector<8x128xf32>
      tpu.vector_store %arg6[%c0_136, %c0_137], %343 {strides = array<i32>} : memref<8x128xf32, #tpu.memory_space<vmem>>, vector<8x128xf32>,
    } else {
    }
    %c0 = arith.constant 0 : index
    %c0_1 = arith.constant 0 : index
    %3 = vector.load %arg2[%c0, %c0_1] : memref<256x512xbf16, #tpu.memory_space<vmem>>, vector<256x512xbf16>
    %c0_2 = arith.constant 0 : index
    %c0_3 = arith.constant 0 : index
    %4 = vector.load %arg3[%c0_2, %c0_3] : memref<1x512xf32, #tpu.memory_space<vmem>>, vector<1x512xf32>
    %c0_i32_4 = arith.constant 0 : i32
    %5 = arith.index_cast %c0_i32_4 : i32 to index
    %c0_5 = arith.constant 0 : index
    %c0_6 = arith.constant 0 : index
    %6 = vector.load %arg1[%5, %c0_5, %c0_6] : memref<8x8x128xbf16, #tpu.memory_space<vmem>>, vector<1x8x128xbf16>
    %7 = vector.shape_cast %6 : vector<1x8x128xbf16> to vector<8x128xbf16>
    %c0_7 = arith.constant 0 : index
    %c0_8 = arith.constant 0 : index
    %8 = vector.load %arg5[%c0_7, %c0_8] : memref<8x128xf32, #tpu.memory_space<vmem>>, vector<8x128xf32>
    %c0_9 = arith.constant 0 : index
    %c0_10 = arith.constant 0 : index
    %9 = vector.load %arg6[%c0_9, %c0_10] : memref<8x128xf32, #tpu.memory_space<vmem>>, vector<8x128xf32>
    %10 = arith.truncf %8 : vector<8x128xf32> to vector<8x128xbf16>
    %11 = tpu.concatenate %7, %10 in 1 : vector<8x128xbf16>, vector<8x128xbf16> -> vector<8x256xbf16>
    %cst = arith.constant dense<0.000000e+00> : vector<8x512xf32>
    %12 = tpu.matmul %11, %3, %cst {dimension_numbers = #tpu.dot_dimension_numbers<[1], [0], [0], [1], [0, 0, 1, 1], [], []>} : vector<8x256xbf16>, vector<256x512xbf16>, vector<8x512xf32> -> vector<8x512xf32>
    %13 = vector.broadcast %4 : vector<1x512xf32> to vector<8x512xf32>
    %14 = arith.addf %12, %13 : vector<8x512xf32>
    %15 = vector.extract_strided_slice %14 {offsets = [0, 0], sizes = [8, 128], strides = [1, 1]} : vector<8x512xf32> to vector<8x128xf32>
    %16 = arith.negf %15 : vector<8x128xf32>
    %17 = math.exp %16 : vector<8x128xf32>
    %cst_11 = arith.constant 1.000000e+00 : f32
    %18 = vector.broadcast %cst_11 : f32 to vector<8x128xf32>
    %19 = arith.addf %18, %17 : vector<8x128xf32>
    %20 = arith.divf %18, %19 : vector<8x128xf32>
    %21 = vector.extract_strided_slice %14 {offsets = [0, 128], sizes = [8, 128], strides = [1, 1]} : vector<8x512xf32> to vector<8x128xf32>
    %22 = arith.negf %21 : vector<8x128xf32>
    %23 = math.exp %22 : vector<8x128xf32>
    %cst_12 = arith.constant 1.000000e+00 : f32
    %24 = vector.broadcast %cst_12 : f32 to vector<8x128xf32>
    %25 = arith.addf %24, %23 : vector<8x128xf32>
    %26 = arith.divf %24, %25 : vector<8x128xf32>
    %27 = vector.extract_strided_slice %14 {offsets = [0, 256], sizes = [8, 128], strides = [1, 1]} : vector<8x512xf32> to vector<8x128xf32>
    %28 = math.tanh %27 : vector<8x128xf32>
    %29 = vector.extract_strided_slice %14 {offsets = [0, 384], sizes = [8, 128], strides = [1, 1]} : vector<8x512xf32> to vector<8x128xf32>
    %30 = arith.negf %29 : vector<8x128xf32>
    %31 = math.exp %30 : vector<8x128xf32>
    %cst_13 = arith.constant 1.000000e+00 : f32
    %32 = vector.broadcast %cst_13 : f32 to vector<8x128xf32>
    %33 = arith.addf %32, %31 : vector<8x128xf32>
    %34 = arith.divf %32, %33 : vector<8x128xf32>
    %35 = arith.mulf %26, %9 : vector<8x128xf32>
    %36 = arith.mulf %20, %28 : vector<8x128xf32>
    %37 = arith.addf %35, %36 : vector<8x128xf32>
    %38 = math.tanh %37 : vector<8x128xf32>
    %39 = arith.mulf %34, %38 : vector<8x128xf32>
    %c0_14 = arith.constant 0 : index
    %c0_15 = arith.constant 0 : index
    %40 = vector.load %arg6[%c0_14, %c0_15] : memref<8x128xf32, #tpu.memory_space<vmem>>, vector<8x128xf32>
    tpu.vector_store %arg6[%c0_14, %c0_15], %37 {strides = array<i32>} : memref<8x128xf32, #tpu.memory_space<vmem>>, vector<8x128xf32>,
    %c0_16 = arith.constant 0 : index
    %c0_17 = arith.constant 0 : index
    %41 = vector.load %arg5[%c0_16, %c0_17] : memref<8x128xf32, #tpu.memory_space<vmem>>, vector<8x128xf32>
    tpu.vector_store %arg5[%c0_16, %c0_17], %39 {strides = array<i32>} : memref<8x128xf32, #tpu.memory_space<vmem>>, vector<8x128xf32>,
    %42 = arith.truncf %39 : vector<8x128xf32> to vector<8x128xbf16>
    %43 = arith.index_cast %c0_i32_4 : i32 to index
    %c0_18 = arith.constant 0 : index
    %c0_19 = arith.constant 0 : index
    %44 = vector.load %arg4[%43, %c0_18, %c0_19] : memref<8x8x128xbf16, #tpu.memory_space<vmem>>, vector<1x8x128xbf16>
    %45 = vector.shape_cast %44 : vector<1x8x128xbf16> to vector<8x128xbf16>
    %46 = vector.shape_cast %42 : vector<8x128xbf16> to vector<1x8x128xbf16>
    tpu.vector_store %arg4[%43, %c0_18, %c0_19], %46 {strides = array<i32>} : memref<8x8x128xbf16, #tpu.memory_space<vmem>>, vector<1x8x128xbf16>,
    %c1_i32 = arith.constant 1 : i32
    %47 = arith.index_cast %c1_i32 : i32 to index
    %c0_20 = arith.constant 0 : index
    %c0_21 = arith.constant 0 : index
    %48 = vector.load %arg1[%47, %c0_20, %c0_21] : memref<8x8x128xbf16, #tpu.memory_space<vmem>>, vector<1x8x128xbf16>
    %49 = vector.shape_cast %48 : vector<1x8x128xbf16> to vector<8x128xbf16>
    %c0_22 = arith.constant 0 : index
    %c0_23 = arith.constant 0 : index
    %50 = vector.load %arg5[%c0_22, %c0_23] : memref<8x128xf32, #tpu.memory_space<vmem>>, vector<8x128xf32>
    %c0_24 = arith.constant 0 : index
    %c0_25 = arith.constant 0 : index
    %51 = vector.load %arg6[%c0_24, %c0_25] : memref<8x128xf32, #tpu.memory_space<vmem>>, vector<8x128xf32>
    %52 = arith.truncf %50 : vector<8x128xf32> to vector<8x128xbf16>
    %53 = tpu.concatenate %49, %52 in 1 : vector<8x128xbf16>, vector<8x128xbf16> -> vector<8x256xbf16>
    %cst_26 = arith.constant dense<0.000000e+00> : vector<8x512xf32>
    %54 = tpu.matmul %53, %3, %cst_26 {dimension_numbers = #tpu.dot_dimension_numbers<[1], [0], [0], [1], [0, 0, 1, 1], [], []>} : vector<8x256xbf16>, vector<256x512xbf16>, vector<8x512xf32> -> vector<8x512xf32>
    %55 = vector.broadcast %4 : vector<1x512xf32> to vector<8x512xf32>
    %56 = arith.addf %54, %55 : vector<8x512xf32>
    %57 = vector.extract_strided_slice %56 {offsets = [0, 0], sizes = [8, 128], strides = [1, 1]} : vector<8x512xf32> to vector<8x128xf32>
    %58 = arith.negf %57 : vector<8x128xf32>
    %59 = math.exp %58 : vector<8x128xf32>
    %cst_27 = arith.constant 1.000000e+00 : f32
    %60 = vector.broadcast %cst_27 : f32 to vector<8x128xf32>
    %61 = arith.addf %60, %59 : vector<8x128xf32>
    %62 = arith.divf %60, %61 : vector<8x128xf32>
    %63 = vector.extract_strided_slice %56 {offsets = [0, 128], sizes = [8, 128], strides = [1, 1]} : vector<8x512xf32> to vector<8x128xf32>
    %64 = arith.negf %63 : vector<8x128xf32>
    %65 = math.exp %64 : vector<8x128xf32>
    %cst_28 = arith.constant 1.000000e+00 : f32
    %66 = vector.broadcast %cst_28 : f32 to vector<8x128xf32>
    %67 = arith.addf %66, %65 : vector<8x128xf32>
    %68 = arith.divf %66, %67 : vector<8x128xf32>
    %69 = vector.extract_strided_slice %56 {offsets = [0, 256], sizes = [8, 128], strides = [1, 1]} : vector<8x512xf32> to vector<8x128xf32>
    %70 = math.tanh %69 : vector<8x128xf32>
    %71 = vector.extract_strided_slice %56 {offsets = [0, 384], sizes = [8, 128], strides = [1, 1]} : vector<8x512xf32> to vector<8x128xf32>
    %72 = arith.negf %71 : vector<8x128xf32>
    %73 = math.exp %72 : vector<8x128xf32>
    %cst_29 = arith.constant 1.000000e+00 : f32
    %74 = vector.broadcast %cst_29 : f32 to vector<8x128xf32>
    %75 = arith.addf %74, %73 : vector<8x128xf32>
    %76 = arith.divf %74, %75 : vector<8x128xf32>
    %77 = arith.mulf %68, %51 : vector<8x128xf32>
    %78 = arith.mulf %62, %70 : vector<8x128xf32>
    %79 = arith.addf %77, %78 : vector<8x128xf32>
    %80 = math.tanh %79 : vector<8x128xf32>
    %81 = arith.mulf %76, %80 : vector<8x128xf32>
    %c0_30 = arith.constant 0 : index
    %c0_31 = arith.constant 0 : index
    %82 = vector.load %arg6[%c0_30, %c0_31] : memref<8x128xf32, #tpu.memory_space<vmem>>, vector<8x128xf32>
    tpu.vector_store %arg6[%c0_30, %c0_31], %79 {strides = array<i32>} : memref<8x128xf32, #tpu.memory_space<vmem>>, vector<8x128xf32>,
    %c0_32 = arith.constant 0 : index
    %c0_33 = arith.constant 0 : index
    %83 = vector.load %arg5[%c0_32, %c0_33] : memref<8x128xf32, #tpu.memory_space<vmem>>, vector<8x128xf32>
    tpu.vector_store %arg5[%c0_32, %c0_33], %81 {strides = array<i32>} : memref<8x128xf32, #tpu.memory_space<vmem>>, vector<8x128xf32>,
    %84 = arith.truncf %81 : vector<8x128xf32> to vector<8x128xbf16>
    %85 = arith.index_cast %c1_i32 : i32 to index
    %c0_34 = arith.constant 0 : index
    %c0_35 = arith.constant 0 : index
    %86 = vector.load %arg4[%85, %c0_34, %c0_35] : memref<8x8x128xbf16, #tpu.memory_space<vmem>>, vector<1x8x128xbf16>
    %87 = vector.shape_cast %86 : vector<1x8x128xbf16> to vector<8x128xbf16>
    %88 = vector.shape_cast %84 : vector<8x128xbf16> to vector<1x8x128xbf16>
    tpu.vector_store %arg4[%85, %c0_34, %c0_35], %88 {strides = array<i32>} : memref<8x8x128xbf16, #tpu.memory_space<vmem>>, vector<1x8x128xbf16>,
    %c2_i32 = arith.constant 2 : i32
    %89 = arith.index_cast %c2_i32 : i32 to index
    %c0_36 = arith.constant 0 : index
    %c0_37 = arith.constant 0 : index
    %90 = vector.load %arg1[%89, %c0_36, %c0_37] : memref<8x8x128xbf16, #tpu.memory_space<vmem>>, vector<1x8x128xbf16>
    %91 = vector.shape_cast %90 : vector<1x8x128xbf16> to vector<8x128xbf16>
    %c0_38 = arith.constant 0 : index
    %c0_39 = arith.constant 0 : index
    %92 = vector.load %arg5[%c0_38, %c0_39] : memref<8x128xf32, #tpu.memory_space<vmem>>, vector<8x128xf32>
    %c0_40 = arith.constant 0 : index
    %c0_41 = arith.constant 0 : index
    %93 = vector.load %arg6[%c0_40, %c0_41] : memref<8x128xf32, #tpu.memory_space<vmem>>, vector<8x128xf32>
    %94 = arith.truncf %92 : vector<8x128xf32> to vector<8x128xbf16>
    %95 = tpu.concatenate %91, %94 in 1 : vector<8x128xbf16>, vector<8x128xbf16> -> vector<8x256xbf16>
    %cst_42 = arith.constant dense<0.000000e+00> : vector<8x512xf32>
    %96 = tpu.matmul %95, %3, %cst_42 {dimension_numbers = #tpu.dot_dimension_numbers<[1], [0], [0], [1], [0, 0, 1, 1], [], []>} : vector<8x256xbf16>, vector<256x512xbf16>, vector<8x512xf32> -> vector<8x512xf32>
    %97 = vector.broadcast %4 : vector<1x512xf32> to vector<8x512xf32>
    %98 = arith.addf %96, %97 : vector<8x512xf32>
    %99 = vector.extract_strided_slice %98 {offsets = [0, 0], sizes = [8, 128], strides = [1, 1]} : vector<8x512xf32> to vector<8x128xf32>
    %100 = arith.negf %99 : vector<8x128xf32>
    %101 = math.exp %100 : vector<8x128xf32>
    %cst_43 = arith.constant 1.000000e+00 : f32
    %102 = vector.broadcast %cst_43 : f32 to vector<8x128xf32>
    %103 = arith.addf %102, %101 : vector<8x128xf32>
    %104 = arith.divf %102, %103 : vector<8x128xf32>
    %105 = vector.extract_strided_slice %98 {offsets = [0, 128], sizes = [8, 128], strides = [1, 1]} : vector<8x512xf32> to vector<8x128xf32>
    %106 = arith.negf %105 : vector<8x128xf32>
    %107 = math.exp %106 : vector<8x128xf32>
    %cst_44 = arith.constant 1.000000e+00 : f32
    %108 = vector.broadcast %cst_44 : f32 to vector<8x128xf32>
    %109 = arith.addf %108, %107 : vector<8x128xf32>
    %110 = arith.divf %108, %109 : vector<8x128xf32>
    %111 = vector.extract_strided_slice %98 {offsets = [0, 256], sizes = [8, 128], strides = [1, 1]} : vector<8x512xf32> to vector<8x128xf32>
    %112 = math.tanh %111 : vector<8x128xf32>
    %113 = vector.extract_strided_slice %98 {offsets = [0, 384], sizes = [8, 128], strides = [1, 1]} : vector<8x512xf32> to vector<8x128xf32>
    %114 = arith.negf %113 : vector<8x128xf32>
    %115 = math.exp %114 : vector<8x128xf32>
    %cst_45 = arith.constant 1.000000e+00 : f32
    %116 = vector.broadcast %cst_45 : f32 to vector<8x128xf32>
    %117 = arith.addf %116, %115 : vector<8x128xf32>
    %118 = arith.divf %116, %117 : vector<8x128xf32>
    %119 = arith.mulf %110, %93 : vector<8x128xf32>
    %120 = arith.mulf %104, %112 : vector<8x128xf32>
    %121 = arith.addf %119, %120 : vector<8x128xf32>
    %122 = math.tanh %121 : vector<8x128xf32>
    %123 = arith.mulf %118, %122 : vector<8x128xf32>
    %c0_46 = arith.constant 0 : index
    %c0_47 = arith.constant 0 : index
    %124 = vector.load %arg6[%c0_46, %c0_47] : memref<8x128xf32, #tpu.memory_space<vmem>>, vector<8x128xf32>
    tpu.vector_store %arg6[%c0_46, %c0_47], %121 {strides = array<i32>} : memref<8x128xf32, #tpu.memory_space<vmem>>, vector<8x128xf32>,
    %c0_48 = arith.constant 0 : index
    %c0_49 = arith.constant 0 : index
    %125 = vector.load %arg5[%c0_48, %c0_49] : memref<8x128xf32, #tpu.memory_space<vmem>>, vector<8x128xf32>
    tpu.vector_store %arg5[%c0_48, %c0_49], %123 {strides = array<i32>} : memref<8x128xf32, #tpu.memory_space<vmem>>, vector<8x128xf32>,
    %126 = arith.truncf %123 : vector<8x128xf32> to vector<8x128xbf16>
    %127 = arith.index_cast %c2_i32 : i32 to index
    %c0_50 = arith.constant 0 : index
    %c0_51 = arith.constant 0 : index
    %128 = vector.load %arg4[%127, %c0_50, %c0_51] : memref<8x8x128xbf16, #tpu.memory_space<vmem>>, vector<1x8x128xbf16>
    %129 = vector.shape_cast %128 : vector<1x8x128xbf16> to vector<8x128xbf16>
    %130 = vector.shape_cast %126 : vector<8x128xbf16> to vector<1x8x128xbf16>
    tpu.vector_store %arg4[%127, %c0_50, %c0_51], %130 {strides = array<i32>} : memref<8x8x128xbf16, #tpu.memory_space<vmem>>, vector<1x8x128xbf16>,
    %c3_i32 = arith.constant 3 : i32
    %131 = arith.index_cast %c3_i32 : i32 to index
    %c0_52 = arith.constant 0 : index
    %c0_53 = arith.constant 0 : index
    %132 = vector.load %arg1[%131, %c0_52, %c0_53] : memref<8x8x128xbf16, #tpu.memory_space<vmem>>, vector<1x8x128xbf16>
    %133 = vector.shape_cast %132 : vector<1x8x128xbf16> to vector<8x128xbf16>
    %c0_54 = arith.constant 0 : index
    %c0_55 = arith.constant 0 : index
    %134 = vector.load %arg5[%c0_54, %c0_55] : memref<8x128xf32, #tpu.memory_space<vmem>>, vector<8x128xf32>
    %c0_56 = arith.constant 0 : index
    %c0_57 = arith.constant 0 : index
    %135 = vector.load %arg6[%c0_56, %c0_57] : memref<8x128xf32, #tpu.memory_space<vmem>>, vector<8x128xf32>
    %136 = arith.truncf %134 : vector<8x128xf32> to vector<8x128xbf16>
    %137 = tpu.concatenate %133, %136 in 1 : vector<8x128xbf16>, vector<8x128xbf16> -> vector<8x256xbf16>
    %cst_58 = arith.constant dense<0.000000e+00> : vector<8x512xf32>
    %138 = tpu.matmul %137, %3, %cst_58 {dimension_numbers = #tpu.dot_dimension_numbers<[1], [0], [0], [1], [0, 0, 1, 1], [], []>} : vector<8x256xbf16>, vector<256x512xbf16>, vector<8x512xf32> -> vector<8x512xf32>
    %139 = vector.broadcast %4 : vector<1x512xf32> to vector<8x512xf32>
    %140 = arith.addf %138, %139 : vector<8x512xf32>
    %141 = vector.extract_strided_slice %140 {offsets = [0, 0], sizes = [8, 128], strides = [1, 1]} : vector<8x512xf32> to vector<8x128xf32>
    %142 = arith.negf %141 : vector<8x128xf32>
    %143 = math.exp %142 : vector<8x128xf32>
    %cst_59 = arith.constant 1.000000e+00 : f32
    %144 = vector.broadcast %cst_59 : f32 to vector<8x128xf32>
    %145 = arith.addf %144, %143 : vector<8x128xf32>
    %146 = arith.divf %144, %145 : vector<8x128xf32>
    %147 = vector.extract_strided_slice %140 {offsets = [0, 128], sizes = [8, 128], strides = [1, 1]} : vector<8x512xf32> to vector<8x128xf32>
    %148 = arith.negf %147 : vector<8x128xf32>
    %149 = math.exp %148 : vector<8x128xf32>
    %cst_60 = arith.constant 1.000000e+00 : f32
    %150 = vector.broadcast %cst_60 : f32 to vector<8x128xf32>
    %151 = arith.addf %150, %149 : vector<8x128xf32>
    %152 = arith.divf %150, %151 : vector<8x128xf32>
    %153 = vector.extract_strided_slice %140 {offsets = [0, 256], sizes = [8, 128], strides = [1, 1]} : vector<8x512xf32> to vector<8x128xf32>
    %154 = math.tanh %153 : vector<8x128xf32>
    %155 = vector.extract_strided_slice %140 {offsets = [0, 384], sizes = [8, 128], strides = [1, 1]} : vector<8x512xf32> to vector<8x128xf32>
    %156 = arith.negf %155 : vector<8x128xf32>
    %157 = math.exp %156 : vector<8x128xf32>
    %cst_61 = arith.constant 1.000000e+00 : f32
    %158 = vector.broadcast %cst_61 : f32 to vector<8x128xf32>
    %159 = arith.addf %158, %157 : vector<8x128xf32>
    %160 = arith.divf %158, %159 : vector<8x128xf32>
    %161 = arith.mulf %152, %135 : vector<8x128xf32>
    %162 = arith.mulf %146, %154 : vector<8x128xf32>
    %163 = arith.addf %161, %162 : vector<8x128xf32>
    %164 = math.tanh %163 : vector<8x128xf32>
    %165 = arith.mulf %160, %164 : vector<8x128xf32>
    %c0_62 = arith.constant 0 : index
    %c0_63 = arith.constant 0 : index
    %166 = vector.load %arg6[%c0_62, %c0_63] : memref<8x128xf32, #tpu.memory_space<vmem>>, vector<8x128xf32>
    tpu.vector_store %arg6[%c0_62, %c0_63], %163 {strides = array<i32>} : memref<8x128xf32, #tpu.memory_space<vmem>>, vector<8x128xf32>,
    %c0_64 = arith.constant 0 : index
    %c0_65 = arith.constant 0 : index
    %167 = vector.load %arg5[%c0_64, %c0_65] : memref<8x128xf32, #tpu.memory_space<vmem>>, vector<8x128xf32>
    tpu.vector_store %arg5[%c0_64, %c0_65], %165 {strides = array<i32>} : memref<8x128xf32, #tpu.memory_space<vmem>>, vector<8x128xf32>,
    %168 = arith.truncf %165 : vector<8x128xf32> to vector<8x128xbf16>
    %169 = arith.index_cast %c3_i32 : i32 to index
    %c0_66 = arith.constant 0 : index
    %c0_67 = arith.constant 0 : index
    %170 = vector.load %arg4[%169, %c0_66, %c0_67] : memref<8x8x128xbf16, #tpu.memory_space<vmem>>, vector<1x8x128xbf16>
    %171 = vector.shape_cast %170 : vector<1x8x128xbf16> to vector<8x128xbf16>
    %172 = vector.shape_cast %168 : vector<8x128xbf16> to vector<1x8x128xbf16>
    tpu.vector_store %arg4[%169, %c0_66, %c0_67], %172 {strides = array<i32>} : memref<8x8x128xbf16, #tpu.memory_space<vmem>>, vector<1x8x128xbf16>,
    %c4_i32 = arith.constant 4 : i32
    %173 = arith.index_cast %c4_i32 : i32 to index
    %c0_68 = arith.constant 0 : index
    %c0_69 = arith.constant 0 : index
    %174 = vector.load %arg1[%173, %c0_68, %c0_69] : memref<8x8x128xbf16, #tpu.memory_space<vmem>>, vector<1x8x128xbf16>
    %175 = vector.shape_cast %174 : vector<1x8x128xbf16> to vector<8x128xbf16>
    %c0_70 = arith.constant 0 : index
    %c0_71 = arith.constant 0 : index
    %176 = vector.load %arg5[%c0_70, %c0_71] : memref<8x128xf32, #tpu.memory_space<vmem>>, vector<8x128xf32>
    %c0_72 = arith.constant 0 : index
    %c0_73 = arith.constant 0 : index
    %177 = vector.load %arg6[%c0_72, %c0_73] : memref<8x128xf32, #tpu.memory_space<vmem>>, vector<8x128xf32>
    %178 = arith.truncf %176 : vector<8x128xf32> to vector<8x128xbf16>
    %179 = tpu.concatenate %175, %178 in 1 : vector<8x128xbf16>, vector<8x128xbf16> -> vector<8x256xbf16>
    %cst_74 = arith.constant dense<0.000000e+00> : vector<8x512xf32>
    %180 = tpu.matmul %179, %3, %cst_74 {dimension_numbers = #tpu.dot_dimension_numbers<[1], [0], [0], [1], [0, 0, 1, 1], [], []>} : vector<8x256xbf16>, vector<256x512xbf16>, vector<8x512xf32> -> vector<8x512xf32>
    %181 = vector.broadcast %4 : vector<1x512xf32> to vector<8x512xf32>
    %182 = arith.addf %180, %181 : vector<8x512xf32>
    %183 = vector.extract_strided_slice %182 {offsets = [0, 0], sizes = [8, 128], strides = [1, 1]} : vector<8x512xf32> to vector<8x128xf32>
    %184 = arith.negf %183 : vector<8x128xf32>
    %185 = math.exp %184 : vector<8x128xf32>
    %cst_75 = arith.constant 1.000000e+00 : f32
    %186 = vector.broadcast %cst_75 : f32 to vector<8x128xf32>
    %187 = arith.addf %186, %185 : vector<8x128xf32>
    %188 = arith.divf %186, %187 : vector<8x128xf32>
    %189 = vector.extract_strided_slice %182 {offsets = [0, 128], sizes = [8, 128], strides = [1, 1]} : vector<8x512xf32> to vector<8x128xf32>
    %190 = arith.negf %189 : vector<8x128xf32>
    %191 = math.exp %190 : vector<8x128xf32>
    %cst_76 = arith.constant 1.000000e+00 : f32
    %192 = vector.broadcast %cst_76 : f32 to vector<8x128xf32>
    %193 = arith.addf %192, %191 : vector<8x128xf32>
    %194 = arith.divf %192, %193 : vector<8x128xf32>
    %195 = vector.extract_strided_slice %182 {offsets = [0, 256], sizes = [8, 128], strides = [1, 1]} : vector<8x512xf32> to vector<8x128xf32>
    %196 = math.tanh %195 : vector<8x128xf32>
    %197 = vector.extract_strided_slice %182 {offsets = [0, 384], sizes = [8, 128], strides = [1, 1]} : vector<8x512xf32> to vector<8x128xf32>
    %198 = arith.negf %197 : vector<8x128xf32>
    %199 = math.exp %198 : vector<8x128xf32>
    %cst_77 = arith.constant 1.000000e+00 : f32
    %200 = vector.broadcast %cst_77 : f32 to vector<8x128xf32>
    %201 = arith.addf %200, %199 : vector<8x128xf32>
    %202 = arith.divf %200, %201 : vector<8x128xf32>
    %203 = arith.mulf %194, %177 : vector<8x128xf32>
    %204 = arith.mulf %188, %196 : vector<8x128xf32>
    %205 = arith.addf %203, %204 : vector<8x128xf32>
    %206 = math.tanh %205 : vector<8x128xf32>
    %207 = arith.mulf %202, %206 : vector<8x128xf32>
    %c0_78 = arith.constant 0 : index
    %c0_79 = arith.constant 0 : index
    %208 = vector.load %arg6[%c0_78, %c0_79] : memref<8x128xf32, #tpu.memory_space<vmem>>, vector<8x128xf32>
    tpu.vector_store %arg6[%c0_78, %c0_79], %205 {strides = array<i32>} : memref<8x128xf32, #tpu.memory_space<vmem>>, vector<8x128xf32>,
    %c0_80 = arith.constant 0 : index
    %c0_81 = arith.constant 0 : index
    %209 = vector.load %arg5[%c0_80, %c0_81] : memref<8x128xf32, #tpu.memory_space<vmem>>, vector<8x128xf32>
    tpu.vector_store %arg5[%c0_80, %c0_81], %207 {strides = array<i32>} : memref<8x128xf32, #tpu.memory_space<vmem>>, vector<8x128xf32>,
    %210 = arith.truncf %207 : vector<8x128xf32> to vector<8x128xbf16>
    %211 = arith.index_cast %c4_i32 : i32 to index
    %c0_82 = arith.constant 0 : index
    %c0_83 = arith.constant 0 : index
    %212 = vector.load %arg4[%211, %c0_82, %c0_83] : memref<8x8x128xbf16, #tpu.memory_space<vmem>>, vector<1x8x128xbf16>
    %213 = vector.shape_cast %212 : vector<1x8x128xbf16> to vector<8x128xbf16>
    %214 = vector.shape_cast %210 : vector<8x128xbf16> to vector<1x8x128xbf16>
    tpu.vector_store %arg4[%211, %c0_82, %c0_83], %214 {strides = array<i32>} : memref<8x8x128xbf16, #tpu.memory_space<vmem>>, vector<1x8x128xbf16>,
    %c5_i32 = arith.constant 5 : i32
    %215 = arith.index_cast %c5_i32 : i32 to index
    %c0_84 = arith.constant 0 : index
    %c0_85 = arith.constant 0 : index
    %216 = vector.load %arg1[%215, %c0_84, %c0_85] : memref<8x8x128xbf16, #tpu.memory_space<vmem>>, vector<1x8x128xbf16>
    %217 = vector.shape_cast %216 : vector<1x8x128xbf16> to vector<8x128xbf16>
    %c0_86 = arith.constant 0 : index
    %c0_87 = arith.constant 0 : index
    %218 = vector.load %arg5[%c0_86, %c0_87] : memref<8x128xf32, #tpu.memory_space<vmem>>, vector<8x128xf32>
    %c0_88 = arith.constant 0 : index
    %c0_89 = arith.constant 0 : index
    %219 = vector.load %arg6[%c0_88, %c0_89] : memref<8x128xf32, #tpu.memory_space<vmem>>, vector<8x128xf32>
    %220 = arith.truncf %218 : vector<8x128xf32> to vector<8x128xbf16>
    %221 = tpu.concatenate %217, %220 in 1 : vector<8x128xbf16>, vector<8x128xbf16> -> vector<8x256xbf16>
    %cst_90 = arith.constant dense<0.000000e+00> : vector<8x512xf32>
    %222 = tpu.matmul %221, %3, %cst_90 {dimension_numbers = #tpu.dot_dimension_numbers<[1], [0], [0], [1], [0, 0, 1, 1], [], []>} : vector<8x256xbf16>, vector<256x512xbf16>, vector<8x512xf32> -> vector<8x512xf32>
    %223 = vector.broadcast %4 : vector<1x512xf32> to vector<8x512xf32>
    %224 = arith.addf %222, %223 : vector<8x512xf32>
    %225 = vector.extract_strided_slice %224 {offsets = [0, 0], sizes = [8, 128], strides = [1, 1]} : vector<8x512xf32> to vector<8x128xf32>
    %226 = arith.negf %225 : vector<8x128xf32>
    %227 = math.exp %226 : vector<8x128xf32>
    %cst_91 = arith.constant 1.000000e+00 : f32
    %228 = vector.broadcast %cst_91 : f32 to vector<8x128xf32>
    %229 = arith.addf %228, %227 : vector<8x128xf32>
    %230 = arith.divf %228, %229 : vector<8x128xf32>
    %231 = vector.extract_strided_slice %224 {offsets = [0, 128], sizes = [8, 128], strides = [1, 1]} : vector<8x512xf32> to vector<8x128xf32>
    %232 = arith.negf %231 : vector<8x128xf32>
    %233 = math.exp %232 : vector<8x128xf32>
    %cst_92 = arith.constant 1.000000e+00 : f32
    %234 = vector.broadcast %cst_92 : f32 to vector<8x128xf32>
    %235 = arith.addf %234, %233 : vector<8x128xf32>
    %236 = arith.divf %234, %235 : vector<8x128xf32>
    %237 = vector.extract_strided_slice %224 {offsets = [0, 256], sizes = [8, 128], strides = [1, 1]} : vector<8x512xf32> to vector<8x128xf32>
    %238 = math.tanh %237 : vector<8x128xf32>
    %239 = vector.extract_strided_slice %224 {offsets = [0, 384], sizes = [8, 128], strides = [1, 1]} : vector<8x512xf32> to vector<8x128xf32>
    %240 = arith.negf %239 : vector<8x128xf32>
    %241 = math.exp %240 : vector<8x128xf32>
    %cst_93 = arith.constant 1.000000e+00 : f32
    %242 = vector.broadcast %cst_93 : f32 to vector<8x128xf32>
    %243 = arith.addf %242, %241 : vector<8x128xf32>
    %244 = arith.divf %242, %243 : vector<8x128xf32>
    %245 = arith.mulf %236, %219 : vector<8x128xf32>
    %246 = arith.mulf %230, %238 : vector<8x128xf32>
    %247 = arith.addf %245, %246 : vector<8x128xf32>
    %248 = math.tanh %247 : vector<8x128xf32>
    %249 = arith.mulf %244, %248 : vector<8x128xf32>
    %c0_94 = arith.constant 0 : index
    %c0_95 = arith.constant 0 : index
    %250 = vector.load %arg6[%c0_94, %c0_95] : memref<8x128xf32, #tpu.memory_space<vmem>>, vector<8x128xf32>
    tpu.vector_store %arg6[%c0_94, %c0_95], %247 {strides = array<i32>} : memref<8x128xf32, #tpu.memory_space<vmem>>, vector<8x128xf32>,
    %c0_96 = arith.constant 0 : index
    %c0_97 = arith.constant 0 : index
    %251 = vector.load %arg5[%c0_96, %c0_97] : memref<8x128xf32, #tpu.memory_space<vmem>>, vector<8x128xf32>
    tpu.vector_store %arg5[%c0_96, %c0_97], %249 {strides = array<i32>} : memref<8x128xf32, #tpu.memory_space<vmem>>, vector<8x128xf32>,
    %252 = arith.truncf %249 : vector<8x128xf32> to vector<8x128xbf16>
    %253 = arith.index_cast %c5_i32 : i32 to index
    %c0_98 = arith.constant 0 : index
    %c0_99 = arith.constant 0 : index
    %254 = vector.load %arg4[%253, %c0_98, %c0_99] : memref<8x8x128xbf16, #tpu.memory_space<vmem>>, vector<1x8x128xbf16>
    %255 = vector.shape_cast %254 : vector<1x8x128xbf16> to vector<8x128xbf16>
    %256 = vector.shape_cast %252 : vector<8x128xbf16> to vector<1x8x128xbf16>
    tpu.vector_store %arg4[%253, %c0_98, %c0_99], %256 {strides = array<i32>} : memref<8x8x128xbf16, #tpu.memory_space<vmem>>, vector<1x8x128xbf16>,
    %c6_i32 = arith.constant 6 : i32
    %257 = arith.index_cast %c6_i32 : i32 to index
    %c0_100 = arith.constant 0 : index
    %c0_101 = arith.constant 0 : index
    %258 = vector.load %arg1[%257, %c0_100, %c0_101] : memref<8x8x128xbf16, #tpu.memory_space<vmem>>, vector<1x8x128xbf16>
    %259 = vector.shape_cast %258 : vector<1x8x128xbf16> to vector<8x128xbf16>
    %c0_102 = arith.constant 0 : index
    %c0_103 = arith.constant 0 : index
    %260 = vector.load %arg5[%c0_102, %c0_103] : memref<8x128xf32, #tpu.memory_space<vmem>>, vector<8x128xf32>
    %c0_104 = arith.constant 0 : index
    %c0_105 = arith.constant 0 : index
    %261 = vector.load %arg6[%c0_104, %c0_105] : memref<8x128xf32, #tpu.memory_space<vmem>>, vector<8x128xf32>
    %262 = arith.truncf %260 : vector<8x128xf32> to vector<8x128xbf16>
    %263 = tpu.concatenate %259, %262 in 1 : vector<8x128xbf16>, vector<8x128xbf16> -> vector<8x256xbf16>
    %cst_106 = arith.constant dense<0.000000e+00> : vector<8x512xf32>
    %264 = tpu.matmul %263, %3, %cst_106 {dimension_numbers = #tpu.dot_dimension_numbers<[1], [0], [0], [1], [0, 0, 1, 1], [], []>} : vector<8x256xbf16>, vector<256x512xbf16>, vector<8x512xf32> -> vector<8x512xf32>
    %265 = vector.broadcast %4 : vector<1x512xf32> to vector<8x512xf32>
    %266 = arith.addf %264, %265 : vector<8x512xf32>
    %267 = vector.extract_strided_slice %266 {offsets = [0, 0], sizes = [8, 128], strides = [1, 1]} : vector<8x512xf32> to vector<8x128xf32>
    %268 = arith.negf %267 : vector<8x128xf32>
    %269 = math.exp %268 : vector<8x128xf32>
    %cst_107 = arith.constant 1.000000e+00 : f32
    %270 = vector.broadcast %cst_107 : f32 to vector<8x128xf32>
    %271 = arith.addf %270, %269 : vector<8x128xf32>
    %272 = arith.divf %270, %271 : vector<8x128xf32>
    %273 = vector.extract_strided_slice %266 {offsets = [0, 128], sizes = [8, 128], strides = [1, 1]} : vector<8x512xf32> to vector<8x128xf32>
    %274 = arith.negf %273 : vector<8x128xf32>
    %275 = math.exp %274 : vector<8x128xf32>
    %cst_108 = arith.constant 1.000000e+00 : f32
    %276 = vector.broadcast %cst_108 : f32 to vector<8x128xf32>
    %277 = arith.addf %276, %275 : vector<8x128xf32>
    %278 = arith.divf %276, %277 : vector<8x128xf32>
    %279 = vector.extract_strided_slice %266 {offsets = [0, 256], sizes = [8, 128], strides = [1, 1]} : vector<8x512xf32> to vector<8x128xf32>
    %280 = math.tanh %279 : vector<8x128xf32>
    %281 = vector.extract_strided_slice %266 {offsets = [0, 384], sizes = [8, 128], strides = [1, 1]} : vector<8x512xf32> to vector<8x128xf32>
    %282 = arith.negf %281 : vector<8x128xf32>
    %283 = math.exp %282 : vector<8x128xf32>
    %cst_109 = arith.constant 1.000000e+00 : f32
    %284 = vector.broadcast %cst_109 : f32 to vector<8x128xf32>
    %285 = arith.addf %284, %283 : vector<8x128xf32>
    %286 = arith.divf %284, %285 : vector<8x128xf32>
    %287 = arith.mulf %278, %261 : vector<8x128xf32>
    %288 = arith.mulf %272, %280 : vector<8x128xf32>
    %289 = arith.addf %287, %288 : vector<8x128xf32>
    %290 = math.tanh %289 : vector<8x128xf32>
    %291 = arith.mulf %286, %290 : vector<8x128xf32>
    %c0_110 = arith.constant 0 : index
    %c0_111 = arith.constant 0 : index
    %292 = vector.load %arg6[%c0_110, %c0_111] : memref<8x128xf32, #tpu.memory_space<vmem>>, vector<8x128xf32>
    tpu.vector_store %arg6[%c0_110, %c0_111], %289 {strides = array<i32>} : memref<8x128xf32, #tpu.memory_space<vmem>>, vector<8x128xf32>,
    %c0_112 = arith.constant 0 : index
    %c0_113 = arith.constant 0 : index
    %293 = vector.load %arg5[%c0_112, %c0_113] : memref<8x128xf32, #tpu.memory_space<vmem>>, vector<8x128xf32>
    tpu.vector_store %arg5[%c0_112, %c0_113], %291 {strides = array<i32>} : memref<8x128xf32, #tpu.memory_space<vmem>>, vector<8x128xf32>,
    %294 = arith.truncf %291 : vector<8x128xf32> to vector<8x128xbf16>
    %295 = arith.index_cast %c6_i32 : i32 to index
    %c0_114 = arith.constant 0 : index
    %c0_115 = arith.constant 0 : index
    %296 = vector.load %arg4[%295, %c0_114, %c0_115] : memref<8x8x128xbf16, #tpu.memory_space<vmem>>, vector<1x8x128xbf16>
    %297 = vector.shape_cast %296 : vector<1x8x128xbf16> to vector<8x128xbf16>
    %298 = vector.shape_cast %294 : vector<8x128xbf16> to vector<1x8x128xbf16>
    tpu.vector_store %arg4[%295, %c0_114, %c0_115], %298 {strides = array<i32>} : memref<8x8x128xbf16, #tpu.memory_space<vmem>>, vector<1x8x128xbf16>,
    %c7_i32 = arith.constant 7 : i32
    %299 = arith.index_cast %c7_i32 : i32 to index
    %c0_116 = arith.constant 0 : index
    %c0_117 = arith.constant 0 : index
    %300 = vector.load %arg1[%299, %c0_116, %c0_117] : memref<8x8x128xbf16, #tpu.memory_space<vmem>>, vector<1x8x128xbf16>
    %301 = vector.shape_cast %300 : vector<1x8x128xbf16> to vector<8x128xbf16>
    %c0_118 = arith.constant 0 : index
    %c0_119 = arith.constant 0 : index
    %302 = vector.load %arg5[%c0_118, %c0_119] : memref<8x128xf32, #tpu.memory_space<vmem>>, vector<8x128xf32>
    %c0_120 = arith.constant 0 : index
    %c0_121 = arith.constant 0 : index
    %303 = vector.load %arg6[%c0_120, %c0_121] : memref<8x128xf32, #tpu.memory_space<vmem>>, vector<8x128xf32>
    %304 = arith.truncf %302 : vector<8x128xf32> to vector<8x128xbf16>
    %305 = tpu.concatenate %301, %304 in 1 : vector<8x128xbf16>, vector<8x128xbf16> -> vector<8x256xbf16>
    %cst_122 = arith.constant dense<0.000000e+00> : vector<8x512xf32>
    %306 = tpu.matmul %305, %3, %cst_122 {dimension_numbers = #tpu.dot_dimension_numbers<[1], [0], [0], [1], [0, 0, 1, 1], [], []>} : vector<8x256xbf16>, vector<256x512xbf16>, vector<8x512xf32> -> vector<8x512xf32>
    %307 = vector.broadcast %4 : vector<1x512xf32> to vector<8x512xf32>
    %308 = arith.addf %306, %307 : vector<8x512xf32>
    %309 = vector.extract_strided_slice %308 {offsets = [0, 0], sizes = [8, 128], strides = [1, 1]} : vector<8x512xf32> to vector<8x128xf32>
    %310 = arith.negf %309 : vector<8x128xf32>
    %311 = math.exp %310 : vector<8x128xf32>
    %cst_123 = arith.constant 1.000000e+00 : f32
    %312 = vector.broadcast %cst_123 : f32 to vector<8x128xf32>
    %313 = arith.addf %312, %311 : vector<8x128xf32>
    %314 = arith.divf %312, %313 : vector<8x128xf32>
    %315 = vector.extract_strided_slice %308 {offsets = [0, 128], sizes = [8, 128], strides = [1, 1]} : vector<8x512xf32> to vector<8x128xf32>
    %316 = arith.negf %315 : vector<8x128xf32>
    %317 = math.exp %316 : vector<8x128xf32>
    %cst_124 = arith.constant 1.000000e+00 : f32
    %318 = vector.broadcast %cst_124 : f32 to vector<8x128xf32>
    %319 = arith.addf %318, %317 : vector<8x128xf32>
    %320 = arith.divf %318, %319 : vector<8x128xf32>
    %321 = vector.extract_strided_slice %308 {offsets = [0, 256], sizes = [8, 128], strides = [1, 1]} : vector<8x512xf32> to vector<8x128xf32>
    %322 = math.tanh %321 : vector<8x128xf32>
    %323 = vector.extract_strided_slice %308 {offsets = [0, 384], sizes = [8, 128], strides = [1, 1]} : vector<8x512xf32> to vector<8x128xf32>
    %324 = arith.negf %323 : vector<8x128xf32>
    %325 = math.exp %324 : vector<8x128xf32>
    %cst_125 = arith.constant 1.000000e+00 : f32
    %326 = vector.broadcast %cst_125 : f32 to vector<8x128xf32>
    %327 = arith.addf %326, %325 : vector<8x128xf32>
    %328 = arith.divf %326, %327 : vector<8x128xf32>
    %329 = arith.mulf %320, %303 : vector<8x128xf32>
    %330 = arith.mulf %314, %322 : vector<8x128xf32>
    %331 = arith.addf %329, %330 : vector<8x128xf32>
    %332 = math.tanh %331 : vector<8x128xf32>
    %333 = arith.mulf %328, %332 : vector<8x128xf32>
    %c0_126 = arith.constant 0 : index
    %c0_127 = arith.constant 0 : index
    %334 = vector.load %arg6[%c0_126, %c0_127] : memref<8x128xf32, #tpu.memory_space<vmem>>, vector<8x128xf32>
    tpu.vector_store %arg6[%c0_126, %c0_127], %331 {strides = array<i32>} : memref<8x128xf32, #tpu.memory_space<vmem>>, vector<8x128xf32>,
    %c0_128 = arith.constant 0 : index
    %c0_129 = arith.constant 0 : index
    %335 = vector.load %arg5[%c0_128, %c0_129] : memref<8x128xf32, #tpu.memory_space<vmem>>, vector<8x128xf32>
    tpu.vector_store %arg5[%c0_128, %c0_129], %333 {strides = array<i32>} : memref<8x128xf32, #tpu.memory_space<vmem>>, vector<8x128xf32>,
    %336 = arith.truncf %333 : vector<8x128xf32> to vector<8x128xbf16>
    %337 = arith.index_cast %c7_i32 : i32 to index
    %c0_130 = arith.constant 0 : index
    %c0_131 = arith.constant 0 : index
    %338 = vector.load %arg4[%337, %c0_130, %c0_131] : memref<8x8x128xbf16, #tpu.memory_space<vmem>>, vector<1x8x128xbf16>
    %339 = vector.shape_cast %338 : vector<1x8x128xbf16> to vector<8x128xbf16>
    %340 = vector.shape_cast %336 : vector<8x128xbf16> to vector<1x8x128xbf16>
    tpu.vector_store %arg4[%337, %c0_130, %c0_131], %340 {strides = array<i32>} : memref<8x8x128xbf16, #tpu.memory_space<vmem>>, vector<1x8x128xbf16>,
    %c8_i32 = arith.constant 8 : i32
    return
  }
  func.func @transform_0(%arg0: i32) -> (i32, i32, i32) {
    %c0_i32 = arith.constant 0 : i32
    %c0_i32_0 = arith.constant 0 : i32
    %c0_i32_1 = arith.constant 0 : i32
    return %arg0, %c0_i32, %c0_i32_0 : i32, i32, i32
  }
  func.func @transform_1(%arg0: i32) -> (i32, i32) {
    %c0_i32 = arith.constant 0 : i32
    %c0_i32_0 = arith.constant 0 : i32
    %c0_i32_1 = arith.constant 0 : i32
    return %c0_i32, %c0_i32_0 : i32, i32
  }
  func.func @transform_2(%arg0: i32) -> (i32, i32) {
    %c0_i32 = arith.constant 0 : i32
    %c0_i32_0 = arith.constant 0 : i32
    %c0_i32_1 = arith.constant 0 : i32
    return %c0_i32, %c0_i32_0 : i32, i32
  }
  func.func @transform_3(%arg0: i32) -> (i32, i32, i32) {
    %c0_i32 = arith.constant 0 : i32
    %c0_i32_0 = arith.constant 0 : i32
    %c0_i32_1 = arith.constant 0 : i32
    return %arg0, %c0_i32, %c0_i32_0 : i32, i32, i32
  }
}

</mosaic_0001>

<bundles_post_ra>
// kernel: tpu_custom_call.1
= control target key start
LH: loop header
LB: loop body
LE: loop exit
PB: predicated region body
PF: predicated region fallthrough
CT: control target
= control target key end

     0   :  { %8 = vsyncpa [#allocation5], 0  ;;  %s2760_s0 = inlined_call_operand.hbm [shape: bf16[8,8,128], index: 0, kind: input, shape index: {}]   ;;  %s2761_s1 = inlined_call_operand.hbm [shape: bf16[256,512], index: 1, kind: input, shape index: {}]   ;;  %s2762_s2 = inlined_call_operand.vmem [shape: f32[1,512], index: 2, kind: input, shape index: {}]   ;;  %s2763_s3 = inlined_call_operand.hbm [shape: bf16[8,8,128], index: 3, kind: output, shape index: {}]  }
   0x1   :  { %9 = vsyncpa [#allocation8], 0 }
   0x2   :  { %10 = vsyncpa [#allocation6], 0  ;;  %s1855_s12 = smov [#allocation4]   ;;  %s1783_s16 = scalar_lea.hbm %s2760_s0, 512 }
   0x3   :  { %s16_s13 = sshll.u32 %s1855_s12, 4  ;;  %p1784_p0 = scmp.ne.s32.totalorder %s2760_s0, %s1783_s16  ;;  %s17_s13 = int_to_ptr.vmem [resolvable:$true] %s16_s13 }
   0x4   :  { %p1787_p1 = scmp.lt.u32.totalorder %s1783_s16, %s2760_s0 }
   0x6   :  { %p1789_p2 = pnand %p1787_p1, %p1784_p0 }
   0x8   :  { %1792 = shalt.err (!%p1789_p2)
}
   0x9   :  { %s1793_s21 = scalar_lea.vmem %s17_s13, 512  ;;  %p1798_p4 = scmp.lt.s32.totalorder %s17_s13, %s17_s13 }
   0xa   :  { %p1794_p3 = scmp.ne.s32.totalorder %s17_s13, %s1793_s21  ;;  %p1799_p5 = scmp.lt.s32.totalorder %s1793_s21, %s1793_s21 }
   0xc   :  { %p1800_p6 = por %p1799_p5, %p1798_p4 }
   0xe   :  { %p1801_p7 = pnand %p1800_p6, %p1794_p3 }
  0x10   :  { %1804 = shalt.err (!%p1801_p7)
}
  0x11   :  { %s1856_s22 = smov 64   ;;  %s1857_s23 = smov 4  }
  0x12   :  { %22 = dma.hbm_to_vmem [thread:$0]  %s2760_s0, 512, %s17_s13, [#allocation5], %s1856_s22, %s1856_s22, %s1857_s23  }
  0x13   :  { %s1858_s26 = smov [#allocation7]   ;;  %s1805_s30 = scalar_lea.hbm %s2761_s1, 8192 }
  0x14   :  { %s28_s27 = sshll.u32 %s1858_s26, 4  ;;  %p1806_p8 = scmp.ne.s32.totalorder %s2761_s1, %s1805_s30  ;;  %s29_s27 = int_to_ptr.vmem [resolvable:$true] %s28_s27 }
  0x15   :  { %p1809_p9 = scmp.lt.u32.totalorder %s1805_s30, %s2761_s1 }
  0x17   :  { %p1811_p10 = pnand %p1809_p9, %p1806_p8 }
  0x19   :  { %1814 = shalt.err (!%p1811_p10)
}
  0x1a   :  { %s1815_s8 = scalar_lea.vmem %s29_s27, 8192  ;;  %p1820_p12 = scmp.lt.s32.totalorder %s29_s27, %s29_s27 }
  0x1b   :  { %p1816_p11 = scmp.ne.s32.totalorder %s29_s27, %s1815_s8  ;;  %p1821_p13 = scmp.lt.s32.totalorder %s1815_s8, %s1815_s8 }
  0x1d   :  { %p1822_p0 = por %p1821_p13, %p1820_p12 }
  0x1f   :  { %p1823_p1 = pnand %p1822_p0, %p1816_p11 }
  0x21   :  { %1826 = shalt.err (!%p1823_p1)
}
  0x22   :  { %s1859_s0 = smov 256   ;;  %s1860_s9 = smov 16  }
  0x23   :  { %34 = dma.hbm_to_vmem [thread:$0]  %s2761_s1, 8192, %s29_s27, [#allocation8], %s1859_s0, %s1859_s0, %s1860_s9  }
  0x24   :  { %1849 = dma.done.wait [#allocation5], 512  }
  0x25   :  { %1850 = vsyncadd [#allocation5], 4294966784 }
  0x26   :  { %1851 = dma.done.wait [#allocation8], 8192  }
  0x27   :  { %1852 = vsyncadd [#allocation8], 4294959104  ;;  %v1861_v0 = vmov 0.0|0.0   ;;  %v1910_v1 = vld [vmem:[#allocation7 + $0x4] ss:$16 sps:$4 sm:$0xff]  }
  0x28   :  { %491 = vmatprep.mubr.bf16.mxu0 %v1861_v0  ;;  %532 = vmatprep.mubr.bf16.mxu1 %v1861_v0  ;;  %2853 = vst [vmem:[#allocation13_spill] sm:$0xff] %v1910_v1  ;;  %v1912_v2 = vld [vmem:[#allocation7] ss:$16 sps:$4 sm:$0xff]   ;;  %v1915_v3 = vld [vmem:[#allocation7 + $0x24] ss:$16 sps:$4 sm:$0xff]  }
  0x29   :  { %459 = vmatprep.subr.bf16.mxu0 %v1910_v1  ;;  %v1918_v4 = vld [vmem:[#allocation7 + $0x20] ss:$16 sps:$4 sm:$0xff]   ;;  %v1921_v5 = vld [vmem:[#allocation7 + $0x44] ss:$16 sps:$4 sm:$0xff]   ;;  %v1923_v6 = vld [vmem:[#allocation7 + $0xc] ss:$16 sps:$4 sm:$0xff]  }
  0x2a   :  { %460 = vmatpush1.bf16.msra.mxu0 %v1912_v2  ;;  %2854 = vst [vmem:[#allocation14_spill] sm:$0xff] %v1923_v6  ;;  %v1925_v7 = vld [vmem:[#allocation7 + $0x8] ss:$16 sps:$4 sm:$0xff]   ;;  %v1928_v8 = vld [vmem:[#allocation7 + $0x40] ss:$16 sps:$4 sm:$0xff]   ;;  %500 = vmatprep.subr.bf16.mxu1 %v1923_v6 }
  0x2b   :  { %461 = vmatprep.subr.bf16.mxu0 %v1915_v3  ;;  %v1932_v9 = vld [vmem:[#allocation7 + $0x64] ss:$16 sps:$4 sm:$0xff]   ;;  %501 = vmatpush1.bf16.msra.mxu1 %v1925_v7  ;;  %v1935_v10 = vld [vmem:[#allocation7 + $0x2c] ss:$16 sps:$4 sm:$0xff]   ;;  %v1937_v11 = vld [vmem:[#allocation7 + $0x28] ss:$16 sps:$4 sm:$0xff]  }
  0x2c   :  { %502 = vmatprep.subr.bf16.mxu1 %v1935_v10  ;;  %v1941_v12 = vld [vmem:[#allocation7 + $0x60] ss:$16 sps:$4 sm:$0xff]   ;;  %v1943_v13 = vld [vmem:[#allocation7 + $0x84] ss:$16 sps:$4 sm:$0xff]   ;;  %v1945_v14 = vld [vmem:[#allocation7 + $0x4c] ss:$16 sps:$4 sm:$0xff]  }
  0x2d   :  { %v1949_v15 = vld [vmem:[#allocation7 + $0x48] ss:$16 sps:$4 sm:$0xff]   ;;  %v1952_v16 = vld [vmem:[#allocation7 + $0x6c] ss:$16 sps:$4 sm:$0xff]   ;;  %v1955_v17 = vld [vmem:[#allocation7 + $0x80] ss:$16 sps:$4 sm:$0xff]  }
  0x2e   :  { %462 = vmatpush1.bf16.msra.mxu0 %v1918_v4  ;;  %v1958_v18 = vld [vmem:[#allocation7 + $0xa4] ss:$16 sps:$4 sm:$0xff]   ;;  %v1961_v19 = vld [vmem:[#allocation7 + $0x68] ss:$16 sps:$4 sm:$0xff]   ;;  %v1964_v20 = vld [vmem:[#allocation7 + $0x8c] ss:$16 sps:$4 sm:$0xff]  }
  0x2f   :  { %463 = vmatprep.subr.bf16.mxu0 %v1921_v5  ;;  %503 = vmatpush1.bf16.msra.mxu1 %v1937_v11  ;;  %v1967_v21 = vld [vmem:[#allocation7 + $0xa0] ss:$16 sps:$4 sm:$0xff]   ;;  %v1969_v22 = vld [vmem:[#allocation7 + $0xc4] ss:$16 sps:$4 sm:$0xff]   ;;  %v1973_v23 = vld [vmem:[#allocation7 + $0x88] ss:$16 sps:$4 sm:$0xff]  }
  0x30   :  { %504 = vmatprep.subr.bf16.mxu1 %v1945_v14  ;;  %v1976_v24 = vld [vmem:[#allocation7 + $0xac] ss:$16 sps:$4 sm:$0xff]   ;;  %v1979_v25 = vld [vmem:[#allocation7 + $0xc0] ss:$16 sps:$4 sm:$0xff]   ;;  %v1982_v26 = vld [vmem:[#allocation7 + $0xe4] ss:$16 sps:$4 sm:$0xff]  }
  0x31   :  { %v1985_v27 = vld [vmem:[#allocation7 + $0xa8] ss:$16 sps:$4 sm:$0xff]   ;;  %v1988_v28 = vld [vmem:[#allocation7 + $0xcc] ss:$16 sps:$4 sm:$0xff]   ;;  %v1991_v29 = vld [vmem:[#allocation7 + $0xe0] ss:$16 sps:$4 sm:$0xff]  }
  0x32   :  { %464 = vmatpush1.bf16.msra.mxu0 %v1928_v8  ;;  %v1993_v30 = vld [vmem:[#allocation7 + $0x104] ss:$16 sps:$4 sm:$0xff]   ;;  %v1997_v31 = vld [vmem:[#allocation7 + $0xc8] ss:$16 sps:$4 sm:$0xff]   ;;  %v2000_v32 = vld [vmem:[#allocation7 + $0xec] ss:$16 sps:$4 sm:$0xff]  }
  0x33   :  { %465 = vmatprep.subr.bf16.mxu0 %v1932_v9  ;;  %505 = vmatpush1.bf16.msra.mxu1 %v1949_v15  ;;  %v2003_v33 = vld [vmem:[#allocation7 + $0x100] ss:$16 sps:$4 sm:$0xff]   ;;  %v2006_v34 = vld [vmem:[#allocation7 + $0x124] ss:$16 sps:$4 sm:$0xff]   ;;  %v2009_v35 = vld [vmem:[#allocation7 + $0xe8] ss:$16 sps:$4 sm:$0xff]  }
  0x34   :  { %506 = vmatprep.subr.bf16.mxu1 %v1952_v16  ;;  %v2012_v36 = vld [vmem:[#allocation7 + $0x10c] ss:$16 sps:$4 sm:$0xff]   ;;  %v2015_v37 = vld [vmem:[#allocation7 + $0x120] ss:$16 sps:$4 sm:$0xff]   ;;  %v2017_v38 = vld [vmem:[#allocation7 + $0x144] ss:$16 sps:$4 sm:$0xff]  }
  0x35   :  { %v2021_v39 = vld [vmem:[#allocation7 + $0x108] ss:$16 sps:$4 sm:$0xff]   ;;  %v2024_v40 = vld [vmem:[#allocation7 + $0x12c] ss:$16 sps:$4 sm:$0xff]   ;;  %v2026_v41 = vld [vmem:[#allocation7 + $0x140] ss:$16 sps:$4 sm:$0xff]  }
  0x36   :  { %466 = vmatpush1.bf16.msra.mxu0 %v1941_v12  ;;  %v2029_v42 = vld [vmem:[#allocation7 + $0x164] ss:$16 sps:$4 sm:$0xff]   ;;  %v2033_v43 = vld [vmem:[#allocation7 + $0x128] ss:$16 sps:$4 sm:$0xff]   ;;  %v2036_v44 = vld [vmem:[#allocation7 + $0x14c] ss:$16 sps:$4 sm:$0xff]  }
  0x37   :  { %467 = vmatprep.subr.bf16.mxu0 %v1943_v13  ;;  %507 = vmatpush1.bf16.msra.mxu1 %v1961_v19  ;;  %2855 = vst [vmem:[#allocation15_spill] sm:$0xff] %v2029_v42  ;;  %v2039_v45 = vld [vmem:[#allocation7 + $0x160] ss:$16 sps:$4 sm:$0xff]   ;;  %v2042_v46 = vld [vmem:[#allocation7 + $0x184] ss:$16 sps:$4 sm:$0xff]  }
  0x38   :  { %508 = vmatprep.subr.bf16.mxu1 %v1964_v20  ;;  %2856 = vst [vmem:[#allocation16_spill] sm:$0xff] %v2039_v45  ;;  %2857 = vst [vmem:[#allocation17_spill] sm:$0xff] %v2042_v46  ;;  %v2045_v47 = vld [vmem:[#allocation7 + $0x148] ss:$16 sps:$4 sm:$0xff]   ;;  %v2048_v48 = vld [vmem:[#allocation7 + $0x16c] ss:$16 sps:$4 sm:$0xff]  }
  0x39   :  { %2858 = vst [vmem:[#allocation18_spill] sm:$0xff] %v2048_v48  ;;  %v2051_v49 = vld [vmem:[#allocation7 + $0x180] ss:$16 sps:$4 sm:$0xff]   ;;  %v2054_v50 = vld [vmem:[#allocation7 + $0x1a4] ss:$16 sps:$4 sm:$0xff]  }
  0x3a   :  { %468 = vmatpush1.bf16.msra.mxu0 %v1955_v17  ;;  %2859 = vst [vmem:[#allocation19_spill] sm:$0xff] %v2051_v49  ;;  %2860 = vst [vmem:[#allocation20_spill] sm:$0xff] %v2054_v50  ;;  %v2057_v51 = vld [vmem:[#allocation7 + $0x168] ss:$16 sps:$4 sm:$0xff]   ;;  %v2060_v52 = vld [vmem:[#allocation7 + $0x18c] ss:$16 sps:$4 sm:$0xff]  }
  0x3b   :  { %469 = vmatprep.subr.bf16.mxu0 %v1958_v18  ;;  %509 = vmatpush1.bf16.msra.mxu1 %v1973_v23  ;;  %2861 = vst [vmem:[#allocation21_spill] sm:$0xff] %v2057_v51  ;;  %2862 = vst [vmem:[#allocation22_spill] sm:$0xff] %v2060_v52  ;;  %v2063_v53 = vld [vmem:[#allocation7 + $0x1a0] ss:$16 sps:$4 sm:$0xff]   ;;  %v2066_v54 = vld [vmem:[#allocation7 + $0x1c4] ss:$16 sps:$4 sm:$0xff]  }
  0x3c   :  { %510 = vmatprep.subr.bf16.mxu1 %v1976_v24  ;;  %2863 = vst [vmem:[#allocation23_spill] sm:$0xff] %v2063_v53  ;;  %2864 = vst [vmem:[#allocation24_spill] sm:$0xff] %v2066_v54  ;;  %v2069_v55 = vld [vmem:[#allocation7 + $0x188] ss:$16 sps:$4 sm:$0xff]   ;;  %v2072_v56 = vld [vmem:[#allocation7 + $0x1ac] ss:$16 sps:$4 sm:$0xff]  }
  0x3d   :  { %2865 = vst [vmem:[#allocation25_spill] sm:$0xff] %v2069_v55  ;;  %2866 = vst [vmem:[#allocation26_spill] sm:$0xff] %v2072_v56  ;;  %v2075_v57 = vld [vmem:[#allocation7 + $0x1c0] ss:$16 sps:$4 sm:$0xff]   ;;  %v2078_v58 = vld [vmem:[#allocation7 + $0x1e4] ss:$16 sps:$4 sm:$0xff]  }
  0x3e   :  { %470 = vmatpush1.bf16.msra.mxu0 %v1967_v21  ;;  %2867 = vst [vmem:[#allocation27_spill] sm:$0xff] %v2075_v57  ;;  %2868 = vst [vmem:[#allocation28_spill] sm:$0xff] %v2078_v58  ;;  %v2081_v59 = vld [vmem:[#allocation7 + $0x1a8] ss:$16 sps:$4 sm:$0xff]   ;;  %v2084_v60 = vld [vmem:[#allocation7 + $0x1cc] ss:$16 sps:$4 sm:$0xff]  }
  0x3f   :  { %471 = vmatprep.subr.bf16.mxu0 %v1969_v22  ;;  %511 = vmatpush1.bf16.msra.mxu1 %v1985_v27  ;;  %2869 = vst [vmem:[#allocation29_spill] sm:$0xff] %v2081_v59  ;;  %2870 = vst [vmem:[#allocation30_spill] sm:$0xff] %v2084_v60  ;;  %v2087_v61 = vld [vmem:[#allocation7 + $0x1e0] ss:$16 sps:$4 sm:$0xff]   ;;  %v2091_v62 = vld [vmem:[#allocation7 + $0x1c8] ss:$16 sps:$4 sm:$0xff]  }
  0x40   :  { %512 = vmatprep.subr.bf16.mxu1 %v1988_v28  ;;  %2871 = vst [vmem:[#allocation31_spill] sm:$0xff] %v2087_v61  ;;  %2872 = vst [vmem:[#allocation32_spill] sm:$0xff] %v2091_v62  ;;  %v2094_v63 = vld [vmem:[#allocation7 + $0x1ec] ss:$16 sps:$4 sm:$0xff]   ;;  %v114_v0 = vld [vmem:[#allocation4] sm:$0xf] }
  0x41   :  { %2873 = vst [vmem:[#allocation33_spill] sm:$0xff] %v2094_v63 }
  0x42   :  { %472 = vmatpush1.bf16.msra.mxu0 %v1979_v25 }
  0x43   :  { %473 = vmatprep.subr.bf16.mxu0 %v1982_v26  ;;  %513 = vmatpush1.bf16.msra.mxu1 %v1997_v31 }
  0x44   :  { %514 = vmatprep.subr.bf16.mxu1 %v2000_v32 }
  0x46   :  { %474 = vmatpush1.bf16.msra.mxu0 %v1991_v29 }
  0x47   :  { %475 = vmatprep.subr.bf16.mxu0 %v1993_v30  ;;  %515 = vmatpush1.bf16.msra.mxu1 %v2009_v35 }
  0x48   :  { %516 = vmatprep.subr.bf16.mxu1 %v2012_v36 }
  0x4a   :  { %476 = vmatpush1.bf16.msra.mxu0 %v2003_v33 }
  0x4b   :  { %477 = vmatprep.subr.bf16.mxu0 %v2006_v34  ;;  %517 = vmatpush1.bf16.msra.mxu1 %v2021_v39 }
  0x4c   :  { %518 = vmatprep.subr.bf16.mxu1 %v2024_v40 }
  0x4e   :  { %478 = vmatpush1.bf16.msra.mxu0 %v2015_v37 }
  0x4f   :  { %479 = vmatprep.subr.bf16.mxu0 %v2017_v38  ;;  %519 = vmatpush1.bf16.msra.mxu1 %v2033_v43 }
  0x50   :  { %520 = vmatprep.subr.bf16.mxu1 %v2036_v44 }
  0x52   :  { %480 = vmatpush1.bf16.msra.mxu0 %v2026_v41 }
  0x53   :  { %481 = vmatprep.subr.bf16.mxu0 %v2029_v42  ;;  %521 = vmatpush1.bf16.msra.mxu1 %v2045_v47 }
  0x54   :  { %522 = vmatprep.subr.bf16.mxu1 %v2048_v48 }
  0x56   :  { %482 = vmatpush1.bf16.msra.mxu0 %v2039_v45 }
  0x57   :  { %483 = vmatprep.subr.bf16.mxu0 %v2042_v46  ;;  %523 = vmatpush1.bf16.msra.mxu1 %v2057_v51 }
  0x58   :  { %524 = vmatprep.subr.bf16.mxu1 %v2060_v52 }
  0x5a   :  { %484 = vmatpush1.bf16.msra.mxu0 %v2051_v49 }
  0x5b   :  { %485 = vmatprep.subr.bf16.mxu0 %v2054_v50  ;;  %525 = vmatpush1.bf16.msra.mxu1 %v2069_v55 }
  0x5c   :  { %526 = vmatprep.subr.bf16.mxu1 %v2072_v56  ;;  %v2098_v56 = vld [vmem:[#allocation7 + $0x1e8] ss:$16 sps:$4 sm:$0xff]  }
  0x5d   :  { %2874 = vst [vmem:[#allocation34_spill] sm:$0xff] %v2098_v56 }
  0x5e   :  { %486 = vmatpush1.bf16.msra.mxu0 %v2063_v53 }
  0x5f   :  { %487 = vmatprep.subr.bf16.mxu0 %v2066_v54  ;;  %527 = vmatpush1.bf16.msra.mxu1 %v2081_v59 }
  0x60   :  { %528 = vmatprep.subr.bf16.mxu1 %v2084_v60 }
  0x62   :  { %488 = vmatpush1.bf16.msra.mxu0 %v2075_v57 }
  0x63   :  { %489 = vmatprep.subr.bf16.mxu0 %v2078_v58  ;;  %529 = vmatpush1.bf16.msra.mxu1 %v2091_v62 }
  0x64   :  { %530 = vmatprep.subr.bf16.mxu1 %v2094_v63 }
  0x66   :  { %490 = vmatpush1.bf16.msra.mxu0 %v2087_v61 }
  0x67   :  { %574 = vmatprep.subr.bf16.mxu0 %v1910_v1  ;;  %531 = vmatpush1.bf16.msra.mxu1 %v2098_v56 }
  0x68   :  { %615 = vmatprep.subr.bf16.mxu1 %v1923_v6 }
  0x69   :  { %492 = vmatmul.mubr.bf16.vlgmr.msra.gmra.mrb[0].mxu0 %v114_v0 }
  0x6a   :  { %575 = vmatpush1.bf16.msra.mxu0 %v1912_v2  ;;  %533 = vmatmul.mubr.bf16.vlgmr.msra.gmra.mrb[0].mxu1 %v114_v0  ;;  %v2875_v0 = vld [vmem:[#allocation26_spill] sm:$0xff] }
  0x6b   :  { %576 = vmatprep.subr.bf16.mxu0 %v1915_v3  ;;  %616 = vmatpush1.bf16.msra.mxu1 %v1925_v7 }
  0x6c   :  { %617 = vmatprep.subr.bf16.mxu1 %v1935_v10 }
  0x6e   :  { %577 = vmatpush1.bf16.msra.mxu0 %v1918_v4 }
  0x6f   :  { %578 = vmatprep.subr.bf16.mxu0 %v1921_v5  ;;  %618 = vmatpush1.bf16.msra.mxu1 %v1937_v11 }
  0x70   :  { %619 = vmatprep.subr.bf16.mxu1 %v1945_v14 }
  0x72   :  { %579 = vmatpush1.bf16.msra.mxu0 %v1928_v8 }
  0x73   :  { %580 = vmatprep.subr.bf16.mxu0 %v1932_v9  ;;  %620 = vmatpush1.bf16.msra.mxu1 %v1949_v15 }
  0x74   :  { %621 = vmatprep.subr.bf16.mxu1 %v1952_v16 }
  0x76   :  { %581 = vmatpush1.bf16.msra.mxu0 %v1941_v12 }
  0x77   :  { %582 = vmatprep.subr.bf16.mxu0 %v1943_v13  ;;  %622 = vmatpush1.bf16.msra.mxu1 %v1961_v19 }
  0x78   :  { %623 = vmatprep.subr.bf16.mxu1 %v1964_v20 }
  0x7a   :  { %583 = vmatpush1.bf16.msra.mxu0 %v1955_v17 }
  0x7b   :  { %584 = vmatprep.subr.bf16.mxu0 %v1958_v18  ;;  %624 = vmatpush1.bf16.msra.mxu1 %v1973_v23 }
  0x7c   :  { %625 = vmatprep.subr.bf16.mxu1 %v1976_v24 }
  0x7e   :  { %585 = vmatpush1.bf16.msra.mxu0 %v1967_v21 }
  0x7f   :  { %586 = vmatprep.subr.bf16.mxu0 %v1969_v22  ;;  %626 = vmatpush1.bf16.msra.mxu1 %v1985_v27 }
  0x80   :  { %627 = vmatprep.subr.bf16.mxu1 %v1988_v28 }
  0x82   :  { %587 = vmatpush1.bf16.msra.mxu0 %v1979_v25 }
  0x83   :  { %588 = vmatprep.subr.bf16.mxu0 %v1982_v26  ;;  %628 = vmatpush1.bf16.msra.mxu1 %v1997_v31 }
  0x84   :  { %629 = vmatprep.subr.bf16.mxu1 %v2000_v32 }
  0x86   :  { %589 = vmatpush1.bf16.msra.mxu0 %v1991_v29 }
  0x87   :  { %590 = vmatprep.subr.bf16.mxu0 %v1993_v30  ;;  %630 = vmatpush1.bf16.msra.mxu1 %v2009_v35 }
  0x88   :  { %631 = vmatprep.subr.bf16.mxu1 %v2012_v36 }
  0x8a   :  { %591 = vmatpush1.bf16.msra.mxu0 %v2003_v33 }
  0x8b   :  { %592 = vmatprep.subr.bf16.mxu0 %v2006_v34  ;;  %632 = vmatpush1.bf16.msra.mxu1 %v2021_v39 }
  0x8c   :  { %633 = vmatprep.subr.bf16.mxu1 %v2024_v40 }
  0x8e   :  { %593 = vmatpush1.bf16.msra.mxu0 %v2015_v37 }
  0x8f   :  { %594 = vmatprep.subr.bf16.mxu0 %v2017_v38  ;;  %634 = vmatpush1.bf16.msra.mxu1 %v2033_v43 }
  0x90   :  { %635 = vmatprep.subr.bf16.mxu1 %v2036_v44 }
  0x92   :  { %595 = vmatpush1.bf16.msra.mxu0 %v2026_v41 }
  0x93   :  { %596 = vmatprep.subr.bf16.mxu0 %v2029_v42  ;;  %636 = vmatpush1.bf16.msra.mxu1 %v2045_v47 }
  0x94   :  { %637 = vmatprep.subr.bf16.mxu1 %v2048_v48 }
  0x96   :  { %597 = vmatpush1.bf16.msra.mxu0 %v2039_v45 }
  0x97   :  { %598 = vmatprep.subr.bf16.mxu0 %v2042_v46  ;;  %638 = vmatpush1.bf16.msra.mxu1 %v2057_v51 }
  0x98   :  { %639 = vmatprep.subr.bf16.mxu1 %v2060_v52 }
  0x9a   :  { %599 = vmatpush1.bf16.msra.mxu0 %v2051_v49 }
  0x9b   :  { %600 = vmatprep.subr.bf16.mxu0 %v2054_v50  ;;  %640 = vmatpush1.bf16.msra.mxu1 %v2069_v55 }
  0x9c   :  { %641 = vmatprep.subr.bf16.mxu1 %v2875_v0 }
  0x9e   :  { %601 = vmatpush1.bf16.msra.mxu0 %v2063_v53 }
  0x9f   :  { %602 = vmatprep.subr.bf16.mxu0 %v2066_v54  ;;  %642 = vmatpush1.bf16.msra.mxu1 %v2081_v59  ;;  %v119_v54 = vlaneseq }
  0xa0   :  { %643 = vmatprep.subr.bf16.mxu1 %v2084_v60 }
  0xa2   :  { %603 = vmatpush1.bf16.msra.mxu0 %v2075_v57  ;;  %v120_v57 = vshrl.u32 %v119_v54, 7 }
  0xa3   :  { %604 = vmatprep.subr.bf16.mxu0 %v2078_v58  ;;  %644 = vmatpush1.bf16.msra.mxu1 %v2091_v62  ;;  %v113_v58 = vld [vmem:[%s2762_s2] sm:$0xf]  ;;  %s1862_s2 = smov [#allocation9]  }
  0xa4   :  { %645 = vmatprep.subr.bf16.mxu1 %v2094_v63  ;;  %v121_v53 = vsub.s32 0, %v120_v57  ;;  %v125_v60 = vsub.s32 1, %v120_v57  ;;  %v133_v62 = vsub.s32 3, %v120_v57  ;;  %v129_v52 = vsub.s32 2, %v120_v57  ;;  %s1386_s13 = sshll.u32 %s1862_s2, 4  ;;  %s1387_s13 = int_to_ptr.vmem [resolvable:$true] %s1386_s13 }
  0xa5   :  { %s1827_s14 = scalar_lea.vmem %s1387_s13, 512  ;;  %p1832_p3 = scmp.lt.s32.totalorder %s1387_s13, %s1387_s13 }
  0xa6   :  { %605 = vmatpush1.bf16.msra.mxu0 %v2087_v61  ;;  %v2171_v59 = vrot.slane %v113_v58, %v121_v53  ;;  %v2173_v61 = vrot.slane %v113_v58, %v125_v60  ;;  %v2177_v55 = vrot.slane %v113_v58, %v133_v62  ;;  %v2180_v45 = vrot.slane %v113_v58, %v129_v52  ;;  %p1828_p2 = scmp.ne.s32.totalorder %s1387_s13, %s1827_s14  ;;  %p1833_p4 = scmp.lt.s32.totalorder %s1827_s14, %s1827_s14 }
  0xa7   :  { %690 = vmatprep.subr.bf16.mxu0 %v1910_v1  ;;  %646 = vmatpush1.bf16.msra.mxu1 %v2098_v56 }
  0xa8   :  { %731 = vmatprep.subr.bf16.mxu1 %v1923_v6  ;;  %2876 = vst [vmem:[#allocation35_spill] sm:$0xff] %v2171_v59  ;;  %p1834_p5 = por %p1833_p4, %p1832_p3 }
  0xaa   :  { %p1835_p6 = pnand %p1834_p5, %p1828_p2 }
 0x13c   :  { %v493_v1 = vpop.f32.mrb[0].mxu0 }
 0x13d   :  { %v494_v63 = vadd.f32 %v493_v1, %v2171_v59  ;;  %v495_v0 = vpop.f32.mrb[1].mxu0  ;;  %v534_v46 = vpop.f32.mrb[0].mxu1 }
 0x13e   :  { %v496_v56 = vadd.f32 %v495_v0, %v2173_v61  ;;  %v497_v6 = vpop.f32.mrb[2].mxu0  ;;  %v536_v53 = vpop.f32.mrb[1].mxu1  ;;  %v535_v0 = vadd.f32 %v534_v46, %v2180_v45 }
 0x13f   :  { %v1463_v50 = vmul.f32 -1.442695, %v494_v63  ;;  %v498_v54 = vpop.f32.mrb[3].mxu0  ;;  %v537_v60 = vadd.f32 %v536_v53, %v2177_v55  ;;  %v538_v51 = vpop.f32.mrb[2].mxu1 }
 0x140   :  { %v1464_v49 = vmul.f32 -1.442695, %v496_v56  ;;  %v539_v1 = vpop.f32.mrb[3].mxu1 }
 0x141   :  { %1591 = vpow2.f32 %v1463_v50  ;;  %v1465_v59 = vmul.f32 -1.442695, %v537_v60 }
 0x142   :  { %1593 = vpow2.f32 %v1464_v49 }
 0x143   :  { %1595 = vpow2.f32 %v1465_v59 }
 0x144   :  { %1597 = vtanh.f32 %v535_v0  ;;  %v570_v0 = vld [vmem:[#allocation4 + $0x4] sm:$0xf] }
 0x14b   :  { %v1592_v6 = vpop.eup %1591 }
 0x14c   :  { %v1594_v63 = vpop.eup %1593  ;;  %v544_v62 = vadd.f32 1.0, %v1592_v6  ;;  %v2877_v6 = vld [vmem:[#allocation16_spill] sm:$0xff] }
 0x14d   :  { %v550_v56 = vadd.f32 1.0, %v1594_v63  ;;  %v1596_v50 = vpop.eup %1595  ;;  %v2878_v63 = vld [vmem:[#allocation21_spill] sm:$0xff] }
 0x14e   :  { %1599 = vrcp.f32 %v544_v62  ;;  %v1598_v49 = vpop.eup %1597  ;;  %v557_v54 = vadd.f32 1.0, %v1596_v50  ;;  %v2879_v62 = vld [vmem:[#allocation17_spill] sm:$0xff]  ;;  %v2881_v50 = vld [vmem:[#allocation19_spill] sm:$0xff] }
 0x14f   :  { %1601 = vrcp.f32 %v550_v56  ;;  %v2880_v56 = vld [vmem:[#allocation22_spill] sm:$0xff] }
 0x150   :  { %1603 = vrcp.f32 %v557_v54  ;;  %v2884_v54 = vld [vmem:[#allocation26_spill] sm:$0xff] }
 0x158   :  { %v1600_v57 = vpop.eup %1599 }
 0x159   :  { %v1602_v53 = vpop.eup %1601  ;;  %v561_v51 = vmul.f32 %v1600_v57, %v1598_v49  ;;  %v2882_v49 = vld [vmem:[#allocation25_spill] sm:$0xff]  ;;  %v2883_v57 = vld [vmem:[#allocation20_spill] sm:$0xff] }
 0x15a   :  { %v560_v52 = vmul.f32 0.0, %v1602_v53  ;;  %v1604_v46 = vpop.eup %1603  ;;  %v2885_v53 = vld [vmem:[#allocation23_spill] sm:$0xff] }
 0x15c   :  { %v2183_v58 = vadd.f32 %v561_v51, %v560_v52  ;;  %v2886_v51 = vld [vmem:[#allocation29_spill] sm:$0xff]  ;;  %v2887_v52 = vld [vmem:[#allocation24_spill] sm:$0xff] }
 0x15e   :  { %1605 = vtanh.f32 %v2183_v58 }
 0x168   :  { %v1606_v59 = vpop.eup %1605 }
 0x169   :  { %v564_v60 = vmul.f32 %v1606_v59, %v1604_v46  ;;  %v2888_v46 = vld [vmem:[#allocation30_spill] sm:$0xff]  ;;  %v2889_v59 = vld [vmem:[#allocation27_spill] sm:$0xff] }
 0x16b   :  { %v567_v1 = vpack.c.bf16 %v564_v60, %v564_v60  ;;  %v2890_v60 = vld [vmem:[#allocation32_spill] sm:$0xff] }
 0x16d   :  { %568 = vst [vmem:[#allocation9] sm:$0xf] %v567_v1  ;;  %606 = vmatprep.mubr.bf16.mxu0 %v567_v1  ;;  %647 = vmatprep.mubr.bf16.mxu1 %v567_v1  ;;  %v2891_v1 = vld [vmem:[#allocation28_spill] sm:$0xff] }
 0x16e   :  { %607 = vmatmul.mubr.bf16.vlgmr.msra.gmra.mrb[4].mxu0 %v570_v0  ;;  %648 = vmatmul.mubr.bf16.vlgmr.msra.gmra.mrb[4].mxu1 %v570_v0  ;;  %v2892_v0 = vld [vmem:[#allocation33_spill] sm:$0xff] }
 0x16f   :  { %691 = vmatpush1.bf16.msra.mxu0 %v1912_v2  ;;  %732 = vmatpush1.bf16.msra.mxu1 %v1925_v7 }
 0x170   :  { %692 = vmatprep.subr.bf16.mxu0 %v1915_v3  ;;  %733 = vmatprep.subr.bf16.mxu1 %v1935_v10 }
 0x173   :  { %693 = vmatpush1.bf16.msra.mxu0 %v1918_v4  ;;  %734 = vmatpush1.bf16.msra.mxu1 %v1937_v11 }
 0x174   :  { %694 = vmatprep.subr.bf16.mxu0 %v1921_v5  ;;  %735 = vmatprep.subr.bf16.mxu1 %v1945_v14 }
 0x177   :  { %695 = vmatpush1.bf16.msra.mxu0 %v1928_v8  ;;  %736 = vmatpush1.bf16.msra.mxu1 %v1949_v15 }
 0x178   :  { %696 = vmatprep.subr.bf16.mxu0 %v1932_v9  ;;  %737 = vmatprep.subr.bf16.mxu1 %v1952_v16 }
 0x17b   :  { %697 = vmatpush1.bf16.msra.mxu0 %v1941_v12  ;;  %738 = vmatpush1.bf16.msra.mxu1 %v1961_v19 }
 0x17c   :  { %698 = vmatprep.subr.bf16.mxu0 %v1943_v13  ;;  %739 = vmatprep.subr.bf16.mxu1 %v1964_v20 }
 0x17f   :  { %699 = vmatpush1.bf16.msra.mxu0 %v1955_v17  ;;  %740 = vmatpush1.bf16.msra.mxu1 %v1973_v23 }
 0x180   :  { %700 = vmatprep.subr.bf16.mxu0 %v1958_v18  ;;  %741 = vmatprep.subr.bf16.mxu1 %v1976_v24 }
 0x183   :  { %701 = vmatpush1.bf16.msra.mxu0 %v1967_v21  ;;  %742 = vmatpush1.bf16.msra.mxu1 %v1985_v27 }
 0x184   :  { %702 = vmatprep.subr.bf16.mxu0 %v1969_v22  ;;  %743 = vmatprep.subr.bf16.mxu1 %v1988_v28 }
 0x187   :  { %703 = vmatpush1.bf16.msra.mxu0 %v1979_v25  ;;  %744 = vmatpush1.bf16.msra.mxu1 %v1997_v31 }
 0x188   :  { %704 = vmatprep.subr.bf16.mxu0 %v1982_v26  ;;  %745 = vmatprep.subr.bf16.mxu1 %v2000_v32 }
 0x18b   :  { %705 = vmatpush1.bf16.msra.mxu0 %v1991_v29  ;;  %746 = vmatpush1.bf16.msra.mxu1 %v2009_v35 }
 0x18c   :  { %706 = vmatprep.subr.bf16.mxu0 %v1993_v30  ;;  %747 = vmatprep.subr.bf16.mxu1 %v2012_v36 }
 0x18f   :  { %707 = vmatpush1.bf16.msra.mxu0 %v2003_v33  ;;  %748 = vmatpush1.bf16.msra.mxu1 %v2021_v39 }
 0x190   :  { %708 = vmatprep.subr.bf16.mxu0 %v2006_v34  ;;  %749 = vmatprep.subr.bf16.mxu1 %v2024_v40 }
 0x193   :  { %709 = vmatpush1.bf16.msra.mxu0 %v2015_v37  ;;  %750 = vmatpush1.bf16.msra.mxu1 %v2033_v43 }
 0x194   :  { %710 = vmatprep.subr.bf16.mxu0 %v2017_v38  ;;  %751 = vmatprep.subr.bf16.mxu1 %v2036_v44 }
 0x197   :  { %711 = vmatpush1.bf16.msra.mxu0 %v2026_v41  ;;  %752 = vmatpush1.bf16.msra.mxu1 %v2045_v47 }
 0x198   :  { %712 = vmatprep.subr.bf16.mxu0 %v2029_v42  ;;  %753 = vmatprep.subr.bf16.mxu1 %v2048_v48 }
 0x19b   :  { %713 = vmatpush1.bf16.msra.mxu0 %v2877_v6  ;;  %754 = vmatpush1.bf16.msra.mxu1 %v2878_v63 }
 0x19c   :  { %714 = vmatprep.subr.bf16.mxu0 %v2879_v62  ;;  %755 = vmatprep.subr.bf16.mxu1 %v2880_v56 }
 0x19f   :  { %715 = vmatpush1.bf16.msra.mxu0 %v2881_v50  ;;  %756 = vmatpush1.bf16.msra.mxu1 %v2882_v49  ;;  %v2893_v49 = vld [vmem:[#allocation31_spill] sm:$0xff] }
 0x1a0   :  { %716 = vmatprep.subr.bf16.mxu0 %v2883_v57  ;;  %757 = vmatprep.subr.bf16.mxu1 %v2884_v54  ;;  %v2894_v57 = vld [vmem:[#allocation34_spill] sm:$0xff]  ;;  %v2895_v54 = vld [vmem:[#allocation13_spill] sm:$0xff]  ;;  %v2897_v50 = vld [vmem:[#allocation35_spill] sm:$0xff] }
 0x1a3   :  { %717 = vmatpush1.bf16.msra.mxu0 %v2885_v53  ;;  %758 = vmatpush1.bf16.msra.mxu1 %v2886_v51  ;;  %v2896_v53 = vld [vmem:[#allocation14_spill] sm:$0xff] }
 0x1a4   :  { %718 = vmatprep.subr.bf16.mxu0 %v2887_v52  ;;  %759 = vmatprep.subr.bf16.mxu1 %v2888_v46 }
 0x1a7   :  { %719 = vmatpush1.bf16.msra.mxu0 %v2889_v59  ;;  %760 = vmatpush1.bf16.msra.mxu1 %v2890_v60 }
 0x1a8   :  { %720 = vmatprep.subr.bf16.mxu0 %v2891_v1  ;;  %761 = vmatprep.subr.bf16.mxu1 %v2892_v0 }
 0x1ab   :  { %721 = vmatpush1.bf16.msra.mxu0 %v2893_v49  ;;  %762 = vmatpush1.bf16.msra.mxu1 %v2894_v57 }
 0x1ac   :  { %806 = vmatprep.subr.bf16.mxu0 %v2895_v54  ;;  %847 = vmatprep.subr.bf16.mxu1 %v2896_v53 }
 0x241   :  { %v608_v51 = vpop.f32.mrb[4].mxu0  ;;  %v649_v52 = vpop.f32.mrb[4].mxu1 }
 0x242   :  { %v609_v46 = vadd.f32 %v608_v51, %v2897_v50  ;;  %v610_v56 = vpop.f32.mrb[5].mxu0  ;;  %v651_v59 = vpop.f32.mrb[5].mxu1  ;;  %v650_v53 = vadd.f32 %v649_v52, %v2180_v45  ;;  %v686_v52 = vld [vmem:[#allocation4 + $0x8] sm:$0xf] }
 0x243   :  { %v611_v60 = vadd.f32 %v610_v56, %v2173_v61  ;;  %v612_v62 = vpop.f32.mrb[6].mxu0  ;;  %v653_v1 = vpop.f32.mrb[6].mxu1  ;;  %v652_v54 = vadd.f32 %v651_v59, %v2177_v55 }
 0x244   :  { %v1466_v63 = vmul.f32 -1.442695, %v609_v46  ;;  %v613_v0 = vpop.f32.mrb[7].mxu0  ;;  %v654_v6 = vpop.f32.mrb[7].mxu1  ;;  %v2908_v1 = vld [vmem:[#allocation23_spill] sm:$0xff] }
 0x245   :  { %v1467_v49 = vmul.f32 -1.442695, %v611_v60  ;;  %v1468_v57 = vmul.f32 -1.442695, %v652_v54  ;;  %v2909_v0 = vld [vmem:[#allocation29_spill] sm:$0xff] }
 0x246   :  { %1607 = vpow2.f32 %v1466_v63 }
 0x247   :  { %1609 = vpow2.f32 %v1467_v49 }
 0x248   :  { %1611 = vpow2.f32 %v1468_v57 }
 0x249   :  { %1613 = vtanh.f32 %v650_v53 }
 0x250   :  { %v1608_v48 = vpop.eup %1607 }
 0x251   :  { %v1610_v51 = vpop.eup %1609  ;;  %v659_v50 = vadd.f32 1.0, %v1608_v48 }
 0x252   :  { %v665_v42 = vadd.f32 1.0, %v1610_v51  ;;  %v1612_v62 = vpop.eup %1611  ;;  %v2910_v51 = vld [vmem:[#allocation24_spill] sm:$0xff] }
 0x253   :  { %1615 = vrcp.f32 %v659_v50  ;;  %v1614_v56 = vpop.eup %1613  ;;  %v672_v6 = vadd.f32 1.0, %v1612_v62  ;;  %v2907_v50 = vld [vmem:[#allocation26_spill] sm:$0xff] }
 0x254   :  { %1617 = vrcp.f32 %v665_v42  ;;  %v2905_v42 = vld [vmem:[#allocation25_spill] sm:$0xff]  ;;  %v2911_v62 = vld [vmem:[#allocation30_spill] sm:$0xff] }
 0x255   :  { %1619 = vrcp.f32 %v672_v6  ;;  %v2914_v6 = vld [vmem:[#allocation28_spill] sm:$0xff] }
 0x25d   :  { %v1616_v46 = vpop.eup %1615 }
 0x25e   :  { %v1618_v60 = vpop.eup %1617  ;;  %v676_v63 = vmul.f32 %v1616_v46, %v1614_v56  ;;  %v2912_v56 = vld [vmem:[#allocation27_spill] sm:$0xff]  ;;  %v2913_v46 = vld [vmem:[#allocation32_spill] sm:$0xff] }
 0x25f   :  { %v675_v49 = vmul.f32 %v1618_v60, %v2183_v58  ;;  %v1620_v57 = vpop.eup %1619  ;;  %v2906_v58 = vld [vmem:[#allocation20_spill] sm:$0xff]  ;;  %v2915_v60 = vld [vmem:[#allocation33_spill] sm:$0xff] }
 0x261   :  { %v2255_v59 = vadd.f32 %v676_v63, %v675_v49  ;;  %v2916_v63 = vld [vmem:[#allocation31_spill] sm:$0xff]  ;;  %v2917_v49 = vld [vmem:[#allocation34_spill] sm:$0xff] }
 0x263   :  { %1621 = vtanh.f32 %v2255_v59 }
 0x26d   :  { %v1622_v54 = vpop.eup %1621 }
 0x26e   :  { %v679_v48 = vmul.f32 %v1622_v54, %v1620_v57  ;;  %v2918_v57 = vld [vmem:[#allocation13_spill] sm:$0xff]  ;;  %v2919_v54 = vld [vmem:[#allocation14_spill] sm:$0xff] }
 0x270   :  { %v682_v53 = vpack.c.bf16 %v679_v48, %v679_v48 }
 0x272   :  { %684 = vst [vmem:[#allocation9 + $0x4] sm:$0xf] %v682_v53  ;;  %722 = vmatprep.mubr.bf16.mxu0 %v682_v53  ;;  %763 = vmatprep.mubr.bf16.mxu1 %v682_v53 }
 0x273   :  { %723 = vmatmul.mubr.bf16.vlgmr.msra.gmra.mrb[8].mxu0 %v686_v52  ;;  %764 = vmatmul.mubr.bf16.vlgmr.msra.gmra.mrb[8].mxu1 %v686_v52  ;;  %v2920_v52 = vld [vmem:[#allocation35_spill] sm:$0xff] }
 0x274   :  { %807 = vmatpush1.bf16.msra.mxu0 %v1912_v2  ;;  %848 = vmatpush1.bf16.msra.mxu1 %v1925_v7  ;;  %v2898_v2 = vld [vmem:[#allocation15_spill] sm:$0xff]  ;;  %v2902_v7 = vld [vmem:[#allocation17_spill] sm:$0xff] }
 0x275   :  { %808 = vmatprep.subr.bf16.mxu0 %v1915_v3  ;;  %849 = vmatprep.subr.bf16.mxu1 %v1935_v10  ;;  %v2899_v3 = vld [vmem:[#allocation18_spill] sm:$0xff] }
 0x278   :  { %809 = vmatpush1.bf16.msra.mxu0 %v1918_v4  ;;  %850 = vmatpush1.bf16.msra.mxu1 %v1937_v11  ;;  %v2900_v4 = vld [vmem:[#allocation16_spill] sm:$0xff] }
 0x279   :  { %810 = vmatprep.subr.bf16.mxu0 %v1921_v5  ;;  %851 = vmatprep.subr.bf16.mxu1 %v1945_v14  ;;  %v2901_v5 = vld [vmem:[#allocation21_spill] sm:$0xff] }
 0x27c   :  { %811 = vmatpush1.bf16.msra.mxu0 %v1928_v8  ;;  %852 = vmatpush1.bf16.msra.mxu1 %v1949_v15  ;;  %v2903_v8 = vld [vmem:[#allocation22_spill] sm:$0xff] }
 0x27d   :  { %812 = vmatprep.subr.bf16.mxu0 %v1932_v9  ;;  %853 = vmatprep.subr.bf16.mxu1 %v1952_v16  ;;  %v2904_v9 = vld [vmem:[#allocation19_spill] sm:$0xff] }
 0x280   :  { %813 = vmatpush1.bf16.msra.mxu0 %v1941_v12  ;;  %854 = vmatpush1.bf16.msra.mxu1 %v1961_v19 }
 0x281   :  { %814 = vmatprep.subr.bf16.mxu0 %v1943_v13  ;;  %855 = vmatprep.subr.bf16.mxu1 %v1964_v20 }
 0x284   :  { %815 = vmatpush1.bf16.msra.mxu0 %v1955_v17  ;;  %856 = vmatpush1.bf16.msra.mxu1 %v1973_v23 }
 0x285   :  { %816 = vmatprep.subr.bf16.mxu0 %v1958_v18  ;;  %857 = vmatprep.subr.bf16.mxu1 %v1976_v24 }
 0x288   :  { %817 = vmatpush1.bf16.msra.mxu0 %v1967_v21  ;;  %858 = vmatpush1.bf16.msra.mxu1 %v1985_v27 }
 0x289   :  { %818 = vmatprep.subr.bf16.mxu0 %v1969_v22  ;;  %859 = vmatprep.subr.bf16.mxu1 %v1988_v28 }
 0x28c   :  { %819 = vmatpush1.bf16.msra.mxu0 %v1979_v25  ;;  %860 = vmatpush1.bf16.msra.mxu1 %v1997_v31 }
 0x28d   :  { %820 = vmatprep.subr.bf16.mxu0 %v1982_v26  ;;  %861 = vmatprep.subr.bf16.mxu1 %v2000_v32 }
 0x290   :  { %821 = vmatpush1.bf16.msra.mxu0 %v1991_v29  ;;  %862 = vmatpush1.bf16.msra.mxu1 %v2009_v35 }
 0x291   :  { %822 = vmatprep.subr.bf16.mxu0 %v1993_v30  ;;  %863 = vmatprep.subr.bf16.mxu1 %v2012_v36 }
 0x294   :  { %823 = vmatpush1.bf16.msra.mxu0 %v2003_v33  ;;  %864 = vmatpush1.bf16.msra.mxu1 %v2021_v39 }
 0x295   :  { %824 = vmatprep.subr.bf16.mxu0 %v2006_v34  ;;  %865 = vmatprep.subr.bf16.mxu1 %v2024_v40 }
 0x298   :  { %825 = vmatpush1.bf16.msra.mxu0 %v2015_v37  ;;  %866 = vmatpush1.bf16.msra.mxu1 %v2033_v43 }
 0x299   :  { %826 = vmatprep.subr.bf16.mxu0 %v2017_v38  ;;  %867 = vmatprep.subr.bf16.mxu1 %v2036_v44 }
 0x29c   :  { %827 = vmatpush1.bf16.msra.mxu0 %v2026_v41  ;;  %868 = vmatpush1.bf16.msra.mxu1 %v2045_v47 }
 0x29d   :  { %828 = vmatprep.subr.bf16.mxu0 %v2898_v2  ;;  %869 = vmatprep.subr.bf16.mxu1 %v2899_v3 }
 0x2a0   :  { %829 = vmatpush1.bf16.msra.mxu0 %v2900_v4  ;;  %870 = vmatpush1.bf16.msra.mxu1 %v2901_v5 }
 0x2a1   :  { %830 = vmatprep.subr.bf16.mxu0 %v2902_v7  ;;  %871 = vmatprep.subr.bf16.mxu1 %v2903_v8 }
 0x2a4   :  { %831 = vmatpush1.bf16.msra.mxu0 %v2904_v9  ;;  %872 = vmatpush1.bf16.msra.mxu1 %v2905_v42 }
 0x2a5   :  { %832 = vmatprep.subr.bf16.mxu0 %v2906_v58  ;;  %873 = vmatprep.subr.bf16.mxu1 %v2907_v50 }
 0x2a8   :  { %833 = vmatpush1.bf16.msra.mxu0 %v2908_v1  ;;  %874 = vmatpush1.bf16.msra.mxu1 %v2909_v0 }
 0x2a9   :  { %834 = vmatprep.subr.bf16.mxu0 %v2910_v51  ;;  %875 = vmatprep.subr.bf16.mxu1 %v2911_v62 }
 0x2ac   :  { %835 = vmatpush1.bf16.msra.mxu0 %v2912_v56  ;;  %876 = vmatpush1.bf16.msra.mxu1 %v2913_v46 }
 0x2ad   :  { %836 = vmatprep.subr.bf16.mxu0 %v2914_v6  ;;  %877 = vmatprep.subr.bf16.mxu1 %v2915_v60 }
 0x2b0   :  { %837 = vmatpush1.bf16.msra.mxu0 %v2916_v63  ;;  %878 = vmatpush1.bf16.msra.mxu1 %v2917_v49 }
 0x2b1   :  { %922 = vmatprep.subr.bf16.mxu0 %v2918_v57  ;;  %963 = vmatprep.subr.bf16.mxu1 %v2919_v54 }
 0x346   :  { %v724_v48 = vpop.f32.mrb[8].mxu0  ;;  %v765_v53 = vpop.f32.mrb[8].mxu1 }
 0x347   :  { %v725_v62 = vadd.f32 %v724_v48, %v2920_v52  ;;  %v726_v51 = vpop.f32.mrb[9].mxu0  ;;  %v767_v56 = vpop.f32.mrb[9].mxu1  ;;  %v766_v54 = vadd.f32 %v765_v53, %v2180_v45  ;;  %v802_v53 = vld [vmem:[#allocation4 + $0xc] sm:$0xf] }
 0x348   :  { %v727_v46 = vadd.f32 %v726_v51, %v2173_v61  ;;  %v728_v0 = vpop.f32.mrb[10].mxu0  ;;  %v769_v6 = vpop.f32.mrb[10].mxu1  ;;  %v768_v57 = vadd.f32 %v767_v56, %v2177_v55 }
 0x349   :  { %v1469_v1 = vmul.f32 -1.442695, %v725_v62  ;;  %v729_v60 = vpop.f32.mrb[11].mxu0  ;;  %v770_v50 = vpop.f32.mrb[11].mxu1 }
 0x34a   :  { %v1470_v63 = vmul.f32 -1.442695, %v727_v46  ;;  %v1471_v49 = vmul.f32 -1.442695, %v768_v57  ;;  %v2340_v57 = vld [vmem:[#allocation7 + $0x20] ss:$16 sps:$4 sm:$0xff]  }
 0x34b   :  { %1623 = vpow2.f32 %v1469_v1 }
 0x34c   :  { %1625 = vpow2.f32 %v1470_v63 }
 0x34d   :  { %1627 = vpow2.f32 %v1471_v49 }
 0x34e   :  { %1629 = vtanh.f32 %v766_v54  ;;  %v2344_v54 = vld [vmem:[#allocation7 + $0x44] ss:$16 sps:$4 sm:$0xff]  }
 0x355   :  { %v1624_v58 = vpop.eup %1623 }
 0x356   :  { %v1626_v48 = vpop.eup %1625  ;;  %v775_v52 = vadd.f32 1.0, %v1624_v58 }
 0x357   :  { %v781_v42 = vadd.f32 1.0, %v1626_v48  ;;  %v1628_v0 = vpop.eup %1627  ;;  %v2348_v48 = vld [vmem:[#allocation7 + $0x40] ss:$16 sps:$4 sm:$0xff]  }
 0x358   :  { %1631 = vrcp.f32 %v775_v52  ;;  %v1630_v51 = vpop.eup %1629  ;;  %v788_v50 = vadd.f32 1.0, %v1628_v0  ;;  %v2336_v52 = vld [vmem:[#allocation7 + $0x24] ss:$16 sps:$4 sm:$0xff]  }
 0x359   :  { %1633 = vrcp.f32 %v781_v42  ;;  %v2330_v42 = vld [vmem:[#allocation7] ss:$16 sps:$4 sm:$0xff]   ;;  %v2352_v0 = vld [vmem:[#allocation7 + $0x64] ss:$16 sps:$4 sm:$0xff]  }
 0x35a   :  { %1635 = vrcp.f32 %v788_v50 }
 0x362   :  { %v1632_v62 = vpop.eup %1631 }
 0x363   :  { %v1634_v46 = vpop.eup %1633  ;;  %v792_v1 = vmul.f32 %v1632_v62, %v1630_v51 }
 0x364   :  { %v791_v6 = vmul.f32 %v1634_v46, %v2255_v59  ;;  %v1636_v60 = vpop.eup %1635  ;;  %v2333_v59 = vld [vmem:[#allocation7 + $0x8] ss:$16 sps:$4 sm:$0xff]  }
 0x366   :  { %v2327_v56 = vadd.f32 %v792_v1, %v791_v6  ;;  %v918_v6 = vld [vmem:[#allocation4 + $0x10] sm:$0xf] }
 0x368   :  { %1637 = vtanh.f32 %v2327_v56 }
 0x372   :  { %v1638_v63 = vpop.eup %1637 }
 0x373   :  { %v795_v58 = vmul.f32 %v1638_v63, %v1636_v60  ;;  %v2427_v60 = vld [vmem:[#allocation7 + $0x28] ss:$16 sps:$4 sm:$0xff]   ;;  %v2431_v63 = vld [vmem:[#allocation7 + $0x4c] ss:$16 sps:$4 sm:$0xff]  }
 0x375   :  { %v798_v49 = vpack.c.bf16 %v795_v58, %v795_v58  ;;  %v2435_v58 = vld [vmem:[#allocation7 + $0x48] ss:$16 sps:$4 sm:$0xff]  }
 0x377   :  { %800 = vst [vmem:[#allocation9 + $0x8] sm:$0xf] %v798_v49  ;;  %838 = vmatprep.mubr.bf16.mxu0 %v798_v49  ;;  %879 = vmatprep.mubr.bf16.mxu1 %v798_v49  ;;  %v2439_v49 = vld [vmem:[#allocation7 + $0x6c] ss:$16 sps:$4 sm:$0xff]  }
 0x378   :  { %839 = vmatmul.mubr.bf16.vlgmr.msra.gmra.mrb[12].mxu0 %v802_v53  ;;  %880 = vmatmul.mubr.bf16.vlgmr.msra.gmra.mrb[12].mxu1 %v802_v53  ;;  %v2442_v53 = vld [vmem:[#allocation7 + $0x60] ss:$16 sps:$4 sm:$0xff]  }
 0x379   :  { %923 = vmatpush1.bf16.msra.mxu0 %v2330_v42  ;;  %964 = vmatpush1.bf16.msra.mxu1 %v2333_v59 }
 0x37a   :  { %924 = vmatprep.subr.bf16.mxu0 %v2336_v52  ;;  %965 = vmatprep.subr.bf16.mxu1 %v1935_v10  ;;  %v2921_v10 = vld [vmem:[#allocation25_spill] sm:$0xff] }
 0x37d   :  { %925 = vmatpush1.bf16.msra.mxu0 %v2340_v57  ;;  %966 = vmatpush1.bf16.msra.mxu1 %v1937_v11  ;;  %v2922_v11 = vld [vmem:[#allocation20_spill] sm:$0xff] }
 0x37e   :  { %926 = vmatprep.subr.bf16.mxu0 %v2344_v54  ;;  %967 = vmatprep.subr.bf16.mxu1 %v1945_v14  ;;  %v2925_v14 = vld [vmem:[#allocation29_spill] sm:$0xff] }
 0x381   :  { %927 = vmatpush1.bf16.msra.mxu0 %v2348_v48  ;;  %968 = vmatpush1.bf16.msra.mxu1 %v1949_v15  ;;  %v2926_v15 = vld [vmem:[#allocation24_spill] sm:$0xff] }
 0x382   :  { %928 = vmatprep.subr.bf16.mxu0 %v2352_v0  ;;  %969 = vmatprep.subr.bf16.mxu1 %v1952_v16  ;;  %v2927_v16 = vld [vmem:[#allocation30_spill] sm:$0xff] }
 0x385   :  { %929 = vmatpush1.bf16.msra.mxu0 %v1941_v12  ;;  %970 = vmatpush1.bf16.msra.mxu1 %v1961_v19  ;;  %v2923_v12 = vld [vmem:[#allocation26_spill] sm:$0xff]  ;;  %v2930_v19 = vld [vmem:[#allocation28_spill] sm:$0xff] }
 0x386   :  { %930 = vmatprep.subr.bf16.mxu0 %v1943_v13  ;;  %971 = vmatprep.subr.bf16.mxu1 %v1964_v20  ;;  %v2924_v13 = vld [vmem:[#allocation23_spill] sm:$0xff]  ;;  %v2931_v20 = vld [vmem:[#allocation33_spill] sm:$0xff] }
 0x389   :  { %931 = vmatpush1.bf16.msra.mxu0 %v1955_v17  ;;  %972 = vmatpush1.bf16.msra.mxu1 %v1973_v23  ;;  %v2928_v17 = vld [vmem:[#allocation27_spill] sm:$0xff] }
 0x38a   :  { %932 = vmatprep.subr.bf16.mxu0 %v1958_v18  ;;  %973 = vmatprep.subr.bf16.mxu1 %v1976_v24  ;;  %v2929_v18 = vld [vmem:[#allocation32_spill] sm:$0xff]  ;;  %v2406_v23 = vld [vmem:[#allocation7 + $0x4] ss:$16 sps:$4 sm:$0xff]  }
 0x38b   :  { %2934 = vst [vmem:[#allocation15_spill] sm:$0xff] %v2406_v23  ;;  %v2409_v24 = vld [vmem:[#allocation7 + $0xc] ss:$16 sps:$4 sm:$0xff]  }
 0x38c   :  { %2935 = vst [vmem:[#allocation18_spill] sm:$0xff] %v2409_v24 }
 0x38d   :  { %933 = vmatpush1.bf16.msra.mxu0 %v1967_v21  ;;  %974 = vmatpush1.bf16.msra.mxu1 %v1985_v27  ;;  %v2932_v21 = vld [vmem:[#allocation31_spill] sm:$0xff] }
 0x38e   :  { %934 = vmatprep.subr.bf16.mxu0 %v1969_v22  ;;  %975 = vmatprep.subr.bf16.mxu1 %v1988_v28  ;;  %v2933_v22 = vld [vmem:[#allocation34_spill] sm:$0xff]  ;;  %v2936_v27 = vld [vmem:[#allocation35_spill] sm:$0xff] }
 0x391   :  { %935 = vmatpush1.bf16.msra.mxu0 %v1979_v25  ;;  %976 = vmatpush1.bf16.msra.mxu1 %v1997_v31 }
 0x392   :  { %936 = vmatprep.subr.bf16.mxu0 %v1982_v26  ;;  %977 = vmatprep.subr.bf16.mxu1 %v2000_v32 }
 0x395   :  { %937 = vmatpush1.bf16.msra.mxu0 %v1991_v29  ;;  %978 = vmatpush1.bf16.msra.mxu1 %v2009_v35 }
 0x396   :  { %938 = vmatprep.subr.bf16.mxu0 %v1993_v30  ;;  %979 = vmatprep.subr.bf16.mxu1 %v2012_v36 }
 0x399   :  { %939 = vmatpush1.bf16.msra.mxu0 %v2003_v33  ;;  %980 = vmatpush1.bf16.msra.mxu1 %v2021_v39 }
 0x39a   :  { %940 = vmatprep.subr.bf16.mxu0 %v2006_v34  ;;  %981 = vmatprep.subr.bf16.mxu1 %v2024_v40 }
 0x39d   :  { %941 = vmatpush1.bf16.msra.mxu0 %v2015_v37  ;;  %982 = vmatpush1.bf16.msra.mxu1 %v2033_v43 }
 0x39e   :  { %942 = vmatprep.subr.bf16.mxu0 %v2017_v38  ;;  %983 = vmatprep.subr.bf16.mxu1 %v2036_v44 }
 0x3a1   :  { %943 = vmatpush1.bf16.msra.mxu0 %v2026_v41  ;;  %984 = vmatpush1.bf16.msra.mxu1 %v2045_v47 }
 0x3a2   :  { %944 = vmatprep.subr.bf16.mxu0 %v2898_v2  ;;  %985 = vmatprep.subr.bf16.mxu1 %v2899_v3 }
 0x3a5   :  { %945 = vmatpush1.bf16.msra.mxu0 %v2900_v4  ;;  %986 = vmatpush1.bf16.msra.mxu1 %v2901_v5 }
 0x3a6   :  { %946 = vmatprep.subr.bf16.mxu0 %v2902_v7  ;;  %987 = vmatprep.subr.bf16.mxu1 %v2903_v8 }
 0x3a9   :  { %947 = vmatpush1.bf16.msra.mxu0 %v2904_v9  ;;  %988 = vmatpush1.bf16.msra.mxu1 %v2921_v10  ;;  %v2445_v10 = vld [vmem:[#allocation7 + $0x68] ss:$16 sps:$4 sm:$0xff]  }
 0x3aa   :  { %948 = vmatprep.subr.bf16.mxu0 %v2922_v11  ;;  %989 = vmatprep.subr.bf16.mxu1 %v2923_v12  ;;  %v2448_v11 = vld [vmem:[#allocation7 + $0x84] ss:$16 sps:$4 sm:$0xff]   ;;  %v2451_v12 = vld [vmem:[#allocation7 + $0x8c] ss:$16 sps:$4 sm:$0xff]  }
 0x3ad   :  { %949 = vmatpush1.bf16.msra.mxu0 %v2924_v13  ;;  %990 = vmatpush1.bf16.msra.mxu1 %v2925_v14  ;;  %v2454_v13 = vld [vmem:[#allocation7 + $0x80] ss:$16 sps:$4 sm:$0xff]   ;;  %v2457_v14 = vld [vmem:[#allocation7 + $0x88] ss:$16 sps:$4 sm:$0xff]  }
 0x3ae   :  { %950 = vmatprep.subr.bf16.mxu0 %v2926_v15  ;;  %991 = vmatprep.subr.bf16.mxu1 %v2927_v16  ;;  %v2460_v15 = vld [vmem:[#allocation7 + $0xa4] ss:$16 sps:$4 sm:$0xff]   ;;  %v2463_v16 = vld [vmem:[#allocation7 + $0xac] ss:$16 sps:$4 sm:$0xff]  }
 0x3b1   :  { %951 = vmatpush1.bf16.msra.mxu0 %v2928_v17  ;;  %992 = vmatpush1.bf16.msra.mxu1 %v2929_v18  ;;  %v2466_v17 = vld [vmem:[#allocation7 + $0xa0] ss:$16 sps:$4 sm:$0xff]   ;;  %v2469_v18 = vld [vmem:[#allocation7 + $0xa8] ss:$16 sps:$4 sm:$0xff]  }
 0x3b2   :  { %952 = vmatprep.subr.bf16.mxu0 %v2930_v19  ;;  %993 = vmatprep.subr.bf16.mxu1 %v2931_v20  ;;  %v2472_v19 = vld [vmem:[#allocation7 + $0xc4] ss:$16 sps:$4 sm:$0xff]   ;;  %v2475_v20 = vld [vmem:[#allocation7 + $0xcc] ss:$16 sps:$4 sm:$0xff]  }
 0x3b5   :  { %953 = vmatpush1.bf16.msra.mxu0 %v2932_v21  ;;  %994 = vmatpush1.bf16.msra.mxu1 %v2933_v22  ;;  %v2478_v21 = vld [vmem:[#allocation7 + $0xc0] ss:$16 sps:$4 sm:$0xff]   ;;  %v2481_v22 = vld [vmem:[#allocation7 + $0xc8] ss:$16 sps:$4 sm:$0xff]  }
 0x3b6   :  { %1038 = vmatprep.subr.bf16.mxu0 %v2406_v23  ;;  %1079 = vmatprep.subr.bf16.mxu1 %v2409_v24 }
 0x44b   :  { %v840_v25 = vpop.f32.mrb[12].mxu0  ;;  %v881_v26 = vpop.f32.mrb[12].mxu1 }
 0x44c   :  { %v841_v28 = vadd.f32 %v840_v25, %v2936_v27  ;;  %v842_v29 = vpop.f32.mrb[13].mxu0  ;;  %v883_v30 = vpop.f32.mrb[13].mxu1  ;;  %v882_v40 = vadd.f32 %v881_v26, %v2180_v45  ;;  %v2484_v25 = vld [vmem:[#allocation7 + $0xe4] ss:$16 sps:$4 sm:$0xff]   ;;  %v2487_v26 = vld [vmem:[#allocation7 + $0xec] ss:$16 sps:$4 sm:$0xff]  }
 0x44d   :  { %v843_v31 = vadd.f32 %v842_v29, %v2173_v61  ;;  %v844_v32 = vpop.f32.mrb[14].mxu0  ;;  %v885_v33 = vpop.f32.mrb[14].mxu1  ;;  %v884_v38 = vadd.f32 %v883_v30, %v2177_v55  ;;  %v2493_v29 = vld [vmem:[#allocation7 + $0xe8] ss:$16 sps:$4 sm:$0xff]   ;;  %v2496_v30 = vld [vmem:[#allocation7 + $0x104] ss:$16 sps:$4 sm:$0xff]  }
 0x44e   :  { %v1472_v34 = vmul.f32 -1.442695, %v841_v28  ;;  %v845_v35 = vpop.f32.mrb[15].mxu0  ;;  %v886_v36 = vpop.f32.mrb[15].mxu1  ;;  %v2490_v28 = vld [vmem:[#allocation7 + $0xe0] ss:$16 sps:$4 sm:$0xff]  }
 0x44f   :  { %v1473_v37 = vmul.f32 -1.442695, %v843_v31  ;;  %v1474_v39 = vmul.f32 -1.442695, %v884_v38  ;;  %v2499_v31 = vld [vmem:[#allocation7 + $0x10c] ss:$16 sps:$4 sm:$0xff]  }
 0x450   :  { %1639 = vpow2.f32 %v1472_v34  ;;  %v2502_v32 = vld [vmem:[#allocation7 + $0x100] ss:$16 sps:$4 sm:$0xff]   ;;  %v2505_v33 = vld [vmem:[#allocation7 + $0x108] ss:$16 sps:$4 sm:$0xff]   ;;  %v2508_v34 = vld [vmem:[#allocation7 + $0x124] ss:$16 sps:$4 sm:$0xff]  }
 0x451   :  { %1641 = vpow2.f32 %v1473_v37  ;;  %v2511_v35 = vld [vmem:[#allocation7 + $0x12c] ss:$16 sps:$4 sm:$0xff]   ;;  %v2514_v36 = vld [vmem:[#allocation7 + $0x120] ss:$16 sps:$4 sm:$0xff]   ;;  %v2517_v37 = vld [vmem:[#allocation7 + $0x128] ss:$16 sps:$4 sm:$0xff]  }
 0x452   :  { %1643 = vpow2.f32 %v1474_v39  ;;  %v2520_v38 = vld [vmem:[#allocation7 + $0x144] ss:$16 sps:$4 sm:$0xff]   ;;  %v2523_v39 = vld [vmem:[#allocation7 + $0x14c] ss:$16 sps:$4 sm:$0xff]  }
 0x453   :  { %1645 = vtanh.f32 %v882_v40  ;;  %v2526_v40 = vld [vmem:[#allocation7 + $0x140] ss:$16 sps:$4 sm:$0xff]  }
 0x45a   :  { %v1640_v41 = vpop.eup %1639 }
 0x45b   :  { %v1642_v43 = vpop.eup %1641  ;;  %v891_v44 = vadd.f32 1.0, %v1640_v41  ;;  %v2529_v41 = vld [vmem:[#allocation7 + $0x148] ss:$16 sps:$4 sm:$0xff]  }
 0x45c   :  { %v897_v47 = vadd.f32 1.0, %v1642_v43  ;;  %v1644_v2 = vpop.eup %1643  ;;  %v2532_v43 = vld [vmem:[#allocation7 + $0x164] ss:$16 sps:$4 sm:$0xff]  }
 0x45d   :  { %1647 = vrcp.f32 %v891_v44  ;;  %v1646_v3 = vpop.eup %1645  ;;  %v904_v5 = vadd.f32 1.0, %v1644_v2  ;;  %2937 = vst [vmem:[#allocation16_spill] sm:$0xff] %v2532_v43  ;;  %v2535_v44 = vld [vmem:[#allocation7 + $0x16c] ss:$16 sps:$4 sm:$0xff]   ;;  %v2541_v2 = vld [vmem:[#allocation7 + $0x168] ss:$16 sps:$4 sm:$0xff]  }
 0x45e   :  { %1649 = vrcp.f32 %v897_v47  ;;  %2938 = vst [vmem:[#allocation21_spill] sm:$0xff] %v2535_v44  ;;  %v2538_v47 = vld [vmem:[#allocation7 + $0x160] ss:$16 sps:$4 sm:$0xff]   ;;  %2940 = vst [vmem:[#allocation22_spill] sm:$0xff] %v2541_v2 }
 0x45f   :  { %1651 = vrcp.f32 %v904_v5  ;;  %2939 = vst [vmem:[#allocation17_spill] sm:$0xff] %v2538_v47  ;;  %v2550_v5 = vld [vmem:[#allocation7 + $0x180] ss:$16 sps:$4 sm:$0xff]  }
 0x460   :  { %2943 = vst [vmem:[#allocation14_spill] sm:$0xff] %v2550_v5 }
 0x467   :  { %v1648_v4 = vpop.eup %1647 }
 0x468   :  { %v1650_v7 = vpop.eup %1649  ;;  %v908_v8 = vmul.f32 %v1648_v4, %v1646_v3  ;;  %v2544_v3 = vld [vmem:[#allocation7 + $0x184] ss:$16 sps:$4 sm:$0xff]   ;;  %v2547_v4 = vld [vmem:[#allocation7 + $0x18c] ss:$16 sps:$4 sm:$0xff]  }
 0x469   :  { %v907_v9 = vmul.f32 %v1650_v7, %v2327_v56  ;;  %v1652_v62 = vpop.eup %1651  ;;  %v2423_v56 = vld [vmem:[#allocation7 + $0x2c] ss:$16 sps:$4 sm:$0xff]   ;;  %2941 = vst [vmem:[#allocation19_spill] sm:$0xff] %v2544_v3  ;;  %2942 = vst [vmem:[#allocation13_spill] sm:$0xff] %v2547_v4  ;;  %v2553_v7 = vld [vmem:[#allocation7 + $0x188] ss:$16 sps:$4 sm:$0xff]  }
 0x46a   :  { %2944 = vst [vmem:[#allocation25_spill] sm:$0xff] %v2553_v7 }
 0x46b   :  { %v2417_v51 = vadd.f32 %v908_v8, %v907_v9  ;;  %v2556_v8 = vld [vmem:[#allocation7 + $0x1a4] ss:$16 sps:$4 sm:$0xff]   ;;  %v2559_v9 = vld [vmem:[#allocation7 + $0x1ac] ss:$16 sps:$4 sm:$0xff]  }
 0x46c   :  { %2945 = vst [vmem:[#allocation20_spill] sm:$0xff] %v2556_v8  ;;  %2946 = vst [vmem:[#allocation26_spill] sm:$0xff] %v2559_v9 }
 0x46d   :  { %1653 = vtanh.f32 %v2417_v51 }
 0x477   :  { %v1654_v50 = vpop.eup %1653 }
 0x478   :  { %v911_v46 = vmul.f32 %v1654_v50, %v1652_v62  ;;  %v2562_v62 = vld [vmem:[#allocation7 + $0x1a0] ss:$16 sps:$4 sm:$0xff]   ;;  %v2565_v50 = vld [vmem:[#allocation7 + $0x1a8] ss:$16 sps:$4 sm:$0xff]  }
 0x479   :  { %2947 = vst [vmem:[#allocation23_spill] sm:$0xff] %v2562_v62  ;;  %2948 = vst [vmem:[#allocation29_spill] sm:$0xff] %v2565_v50 }
 0x47a   :  { %v914_v1 = vpack.c.bf16 %v911_v46, %v911_v46  ;;  %v2568_v46 = vld [vmem:[#allocation7 + $0x1c4] ss:$16 sps:$4 sm:$0xff]  }
 0x47b   :  { %2949 = vst [vmem:[#allocation24_spill] sm:$0xff] %v2568_v46 }
 0x47c   :  { %916 = vst [vmem:[#allocation9 + $0xc] sm:$0xf] %v914_v1  ;;  %954 = vmatprep.mubr.bf16.mxu0 %v914_v1  ;;  %995 = vmatprep.mubr.bf16.mxu1 %v914_v1  ;;  %v2571_v1 = vld [vmem:[#allocation7 + $0x1cc] ss:$16 sps:$4 sm:$0xff]  }
 0x47d   :  { %955 = vmatmul.mubr.bf16.vlgmr.msra.gmra.mrb[16].mxu0 %v918_v6  ;;  %996 = vmatmul.mubr.bf16.vlgmr.msra.gmra.mrb[16].mxu1 %v918_v6  ;;  %2950 = vst [vmem:[#allocation30_spill] sm:$0xff] %v2571_v1  ;;  %v2574_v6 = vld [vmem:[#allocation7 + $0x1c0] ss:$16 sps:$4 sm:$0xff]  }
 0x47e   :  { %1039 = vmatpush1.bf16.msra.mxu0 %v2330_v42  ;;  %1080 = vmatpush1.bf16.msra.mxu1 %v2333_v59  ;;  %2951 = vst [vmem:[#allocation27_spill] sm:$0xff] %v2574_v6 }
 0x47f   :  { %1040 = vmatprep.subr.bf16.mxu0 %v2336_v52  ;;  %1081 = vmatprep.subr.bf16.mxu1 %v2423_v56 }
 0x482   :  { %1041 = vmatpush1.bf16.msra.mxu0 %v2340_v57  ;;  %1082 = vmatpush1.bf16.msra.mxu1 %v2427_v60 }
 0x483   :  { %1042 = vmatprep.subr.bf16.mxu0 %v2344_v54  ;;  %1083 = vmatprep.subr.bf16.mxu1 %v2431_v63 }
 0x486   :  { %1043 = vmatpush1.bf16.msra.mxu0 %v2348_v48  ;;  %1084 = vmatpush1.bf16.msra.mxu1 %v2435_v58 }
 0x487   :  { %1044 = vmatprep.subr.bf16.mxu0 %v2352_v0  ;;  %1085 = vmatprep.subr.bf16.mxu1 %v2439_v49 }
 0x48a   :  { %1045 = vmatpush1.bf16.msra.mxu0 %v2442_v53  ;;  %1086 = vmatpush1.bf16.msra.mxu1 %v2445_v10 }
 0x48b   :  { %1046 = vmatprep.subr.bf16.mxu0 %v2448_v11  ;;  %1087 = vmatprep.subr.bf16.mxu1 %v2451_v12 }
 0x48e   :  { %1047 = vmatpush1.bf16.msra.mxu0 %v2454_v13  ;;  %1088 = vmatpush1.bf16.msra.mxu1 %v2457_v14 }
 0x48f   :  { %1048 = vmatprep.subr.bf16.mxu0 %v2460_v15  ;;  %1089 = vmatprep.subr.bf16.mxu1 %v2463_v16 }
 0x492   :  { %1049 = vmatpush1.bf16.msra.mxu0 %v2466_v17  ;;  %1090 = vmatpush1.bf16.msra.mxu1 %v2469_v18 }
 0x493   :  { %1050 = vmatprep.subr.bf16.mxu0 %v2472_v19  ;;  %1091 = vmatprep.subr.bf16.mxu1 %v2475_v20 }
 0x496   :  { %1051 = vmatpush1.bf16.msra.mxu0 %v2478_v21  ;;  %1092 = vmatpush1.bf16.msra.mxu1 %v2481_v22 }
 0x497   :  { %1052 = vmatprep.subr.bf16.mxu0 %v2484_v25  ;;  %1093 = vmatprep.subr.bf16.mxu1 %v2487_v26 }
 0x49a   :  { %1053 = vmatpush1.bf16.msra.mxu0 %v2490_v28  ;;  %1094 = vmatpush1.bf16.msra.mxu1 %v2493_v29 }
 0x49b   :  { %1054 = vmatprep.subr.bf16.mxu0 %v2496_v30  ;;  %1095 = vmatprep.subr.bf16.mxu1 %v2499_v31 }
 0x49e   :  { %1055 = vmatpush1.bf16.msra.mxu0 %v2502_v32  ;;  %1096 = vmatpush1.bf16.msra.mxu1 %v2505_v33 }
 0x49f   :  { %1056 = vmatprep.subr.bf16.mxu0 %v2508_v34  ;;  %1097 = vmatprep.subr.bf16.mxu1 %v2511_v35 }
 0x4a2   :  { %1057 = vmatpush1.bf16.msra.mxu0 %v2514_v36  ;;  %1098 = vmatpush1.bf16.msra.mxu1 %v2517_v37 }
 0x4a3   :  { %1058 = vmatprep.subr.bf16.mxu0 %v2520_v38  ;;  %1099 = vmatprep.subr.bf16.mxu1 %v2523_v39 }
 0x4a6   :  { %1059 = vmatpush1.bf16.msra.mxu0 %v2526_v40  ;;  %1100 = vmatpush1.bf16.msra.mxu1 %v2529_v41 }
 0x4a7   :  { %1060 = vmatprep.subr.bf16.mxu0 %v2532_v43  ;;  %1101 = vmatprep.subr.bf16.mxu1 %v2535_v44 }
 0x4aa   :  { %1061 = vmatpush1.bf16.msra.mxu0 %v2538_v47  ;;  %1102 = vmatpush1.bf16.msra.mxu1 %v2541_v2 }
 0x4ab   :  { %1062 = vmatprep.subr.bf16.mxu0 %v2544_v3  ;;  %1103 = vmatprep.subr.bf16.mxu1 %v2547_v4 }
 0x4ae   :  { %1063 = vmatpush1.bf16.msra.mxu0 %v2550_v5  ;;  %1104 = vmatpush1.bf16.msra.mxu1 %v2553_v7 }
 0x4af   :  { %1064 = vmatprep.subr.bf16.mxu0 %v2556_v8  ;;  %1105 = vmatprep.subr.bf16.mxu1 %v2559_v9  ;;  %v2577_v9 = vld [vmem:[#allocation7 + $0x1c8] ss:$16 sps:$4 sm:$0xff]  }
 0x4b0   :  { %2952 = vst [vmem:[#allocation32_spill] sm:$0xff] %v2577_v9 }
 0x4b2   :  { %1065 = vmatpush1.bf16.msra.mxu0 %v2562_v62  ;;  %1106 = vmatpush1.bf16.msra.mxu1 %v2565_v50  ;;  %v2580_v62 = vld [vmem:[#allocation7 + $0x1e4] ss:$16 sps:$4 sm:$0xff]   ;;  %v2583_v50 = vld [vmem:[#allocation7 + $0x1ec] ss:$16 sps:$4 sm:$0xff]  }
 0x4b3   :  { %1066 = vmatprep.subr.bf16.mxu0 %v2568_v46  ;;  %1107 = vmatprep.subr.bf16.mxu1 %v2571_v1  ;;  %2953 = vst [vmem:[#allocation28_spill] sm:$0xff] %v2580_v62  ;;  %2954 = vst [vmem:[#allocation33_spill] sm:$0xff] %v2583_v50  ;;  %v2586_v46 = vld [vmem:[#allocation7 + $0x1e0] ss:$16 sps:$4 sm:$0xff]   ;;  %v2589_v1 = vld [vmem:[#allocation7 + $0x1e8] ss:$16 sps:$4 sm:$0xff]  }
 0x4b4   :  { %2955 = vst [vmem:[#allocation31_spill] sm:$0xff] %v2586_v46  ;;  %2956 = vst [vmem:[#allocation34_spill] sm:$0xff] %v2589_v1 }
 0x4b6   :  { %1067 = vmatpush1.bf16.msra.mxu0 %v2574_v6  ;;  %1108 = vmatpush1.bf16.msra.mxu1 %v2577_v9 }
 0x4b7   :  { %1068 = vmatprep.subr.bf16.mxu0 %v2580_v62  ;;  %1109 = vmatprep.subr.bf16.mxu1 %v2583_v50 }
 0x4ba   :  { %1069 = vmatpush1.bf16.msra.mxu0 %v2586_v46  ;;  %1110 = vmatpush1.bf16.msra.mxu1 %v2589_v1 }
 0x4bb   :  { %1154 = vmatprep.subr.bf16.mxu0 %v2406_v23  ;;  %1195 = vmatprep.subr.bf16.mxu1 %v2409_v24 }
 0x550   :  { %v956_v9 = vpop.f32.mrb[16].mxu0  ;;  %v997_v6 = vpop.f32.mrb[16].mxu1 }
 0x551   :  { %v957_v62 = vadd.f32 %v956_v9, %v2936_v27  ;;  %v958_v8 = vpop.f32.mrb[17].mxu0  ;;  %v999_v7 = vpop.f32.mrb[17].mxu1  ;;  %v998_v24 = vadd.f32 %v997_v6, %v2180_v45  ;;  %v2961_v6 = vld [vmem:[#allocation19_spill] sm:$0xff] }
 0x552   :  { %v959_v50 = vadd.f32 %v958_v8, %v2173_v61  ;;  %v960_v5 = vpop.f32.mrb[18].mxu0  ;;  %v1001_v4 = vpop.f32.mrb[18].mxu1  ;;  %v1000_v23 = vadd.f32 %v999_v7, %v2177_v55 }
 0x553   :  { %v1475_v3 = vmul.f32 -1.442695, %v957_v62  ;;  %v961_v46 = vpop.f32.mrb[19].mxu0  ;;  %v1002_v2 = vpop.f32.mrb[19].mxu1 }
 0x554   :  { %v1476_v47 = vmul.f32 -1.442695, %v959_v50  ;;  %v1477_v1 = vmul.f32 -1.442695, %v1000_v23  ;;  %v1034_v46 = vld [vmem:[#allocation4 + $0x14] sm:$0xf] }
 0x555   :  { %1655 = vpow2.f32 %v1475_v3 }
 0x556   :  { %1657 = vpow2.f32 %v1476_v47 }
 0x557   :  { %1659 = vpow2.f32 %v1477_v1  ;;  %v2960_v1 = vld [vmem:[#allocation22_spill] sm:$0xff] }
 0x558   :  { %1661 = vtanh.f32 %v998_v24 }
 0x55f   :  { %v1656_v44 = vpop.eup %1655 }
 0x560   :  { %v1658_v9 = vpop.eup %1657  ;;  %v1007_v27 = vadd.f32 1.0, %v1656_v44 }
 0x561   :  { %v1013_v43 = vadd.f32 1.0, %v1658_v9  ;;  %v1660_v4 = vpop.eup %1659  ;;  %v2962_v9 = vld [vmem:[#allocation13_spill] sm:$0xff] }
 0x562   :  { %1663 = vrcp.f32 %v1007_v27  ;;  %v1662_v5 = vpop.eup %1661  ;;  %v1020_v2 = vadd.f32 1.0, %v1660_v4  ;;  %v2957_v27 = vld [vmem:[#allocation16_spill] sm:$0xff]  ;;  %v2963_v4 = vld [vmem:[#allocation14_spill] sm:$0xff] }
 0x563   :  { %1665 = vrcp.f32 %v1013_v43  ;;  %v2959_v43 = vld [vmem:[#allocation17_spill] sm:$0xff] }
 0x564   :  { %1667 = vrcp.f32 %v1020_v2  ;;  %v2966_v2 = vld [vmem:[#allocation26_spill] sm:$0xff] }
 0x56c   :  { %v1664_v8 = vpop.eup %1663 }
 0x56d   :  { %v1666_v62 = vpop.eup %1665  ;;  %v1024_v3 = vmul.f32 %v1664_v8, %v1662_v5  ;;  %v2964_v5 = vld [vmem:[#allocation25_spill] sm:$0xff]  ;;  %v2965_v8 = vld [vmem:[#allocation20_spill] sm:$0xff] }
 0x56e   :  { %v1023_v47 = vmul.f32 %v1666_v62, %v2417_v51  ;;  %v1668_v23 = vpop.eup %1667  ;;  %v2958_v51 = vld [vmem:[#allocation21_spill] sm:$0xff]  ;;  %v2967_v62 = vld [vmem:[#allocation23_spill] sm:$0xff] }
 0x570   :  { %v2599_v7 = vadd.f32 %v1024_v3, %v1023_v47  ;;  %v2968_v3 = vld [vmem:[#allocation29_spill] sm:$0xff]  ;;  %v2969_v47 = vld [vmem:[#allocation24_spill] sm:$0xff] }
 0x572   :  { %1669 = vtanh.f32 %v2599_v7 }
 0x57c   :  { %v1670_v50 = vpop.eup %1669 }
 0x57d   :  { %v1027_v44 = vmul.f32 %v1670_v50, %v1668_v23  ;;  %v2970_v23 = vld [vmem:[#allocation30_spill] sm:$0xff]  ;;  %v2971_v50 = vld [vmem:[#allocation27_spill] sm:$0xff] }
 0x57f   :  { %v1030_v24 = vpack.c.bf16 %v1027_v44, %v1027_v44  ;;  %v2972_v44 = vld [vmem:[#allocation32_spill] sm:$0xff] }
 0x581   :  { %1032 = vst [vmem:[#allocation9 + $0x10] sm:$0xf] %v1030_v24  ;;  %1070 = vmatprep.mubr.bf16.mxu0 %v1030_v24  ;;  %1111 = vmatprep.mubr.bf16.mxu1 %v1030_v24  ;;  %v2973_v24 = vld [vmem:[#allocation28_spill] sm:$0xff] }
 0x582   :  { %1071 = vmatmul.mubr.bf16.vlgmr.msra.gmra.mrb[20].mxu0 %v1034_v46  ;;  %1112 = vmatmul.mubr.bf16.vlgmr.msra.gmra.mrb[20].mxu1 %v1034_v46  ;;  %v2974_v46 = vld [vmem:[#allocation33_spill] sm:$0xff] }
 0x583   :  { %1155 = vmatpush1.bf16.msra.mxu0 %v2330_v42  ;;  %1196 = vmatpush1.bf16.msra.mxu1 %v2333_v59 }
 0x584   :  { %1156 = vmatprep.subr.bf16.mxu0 %v2336_v52  ;;  %1197 = vmatprep.subr.bf16.mxu1 %v2423_v56 }
 0x587   :  { %1157 = vmatpush1.bf16.msra.mxu0 %v2340_v57  ;;  %1198 = vmatpush1.bf16.msra.mxu1 %v2427_v60 }
 0x588   :  { %1158 = vmatprep.subr.bf16.mxu0 %v2344_v54  ;;  %1199 = vmatprep.subr.bf16.mxu1 %v2431_v63 }
 0x58b   :  { %1159 = vmatpush1.bf16.msra.mxu0 %v2348_v48  ;;  %1200 = vmatpush1.bf16.msra.mxu1 %v2435_v58 }
 0x58c   :  { %1160 = vmatprep.subr.bf16.mxu0 %v2352_v0  ;;  %1201 = vmatprep.subr.bf16.mxu1 %v2439_v49 }
 0x58f   :  { %1161 = vmatpush1.bf16.msra.mxu0 %v2442_v53  ;;  %1202 = vmatpush1.bf16.msra.mxu1 %v2445_v10 }
 0x590   :  { %1162 = vmatprep.subr.bf16.mxu0 %v2448_v11  ;;  %1203 = vmatprep.subr.bf16.mxu1 %v2451_v12 }
 0x593   :  { %1163 = vmatpush1.bf16.msra.mxu0 %v2454_v13  ;;  %1204 = vmatpush1.bf16.msra.mxu1 %v2457_v14 }
 0x594   :  { %1164 = vmatprep.subr.bf16.mxu0 %v2460_v15  ;;  %1205 = vmatprep.subr.bf16.mxu1 %v2463_v16 }
 0x597   :  { %1165 = vmatpush1.bf16.msra.mxu0 %v2466_v17  ;;  %1206 = vmatpush1.bf16.msra.mxu1 %v2469_v18 }
 0x598   :  { %1166 = vmatprep.subr.bf16.mxu0 %v2472_v19  ;;  %1207 = vmatprep.subr.bf16.mxu1 %v2475_v20 }
 0x59b   :  { %1167 = vmatpush1.bf16.msra.mxu0 %v2478_v21  ;;  %1208 = vmatpush1.bf16.msra.mxu1 %v2481_v22 }
 0x59c   :  { %1168 = vmatprep.subr.bf16.mxu0 %v2484_v25  ;;  %1209 = vmatprep.subr.bf16.mxu1 %v2487_v26 }
 0x59f   :  { %1169 = vmatpush1.bf16.msra.mxu0 %v2490_v28  ;;  %1210 = vmatpush1.bf16.msra.mxu1 %v2493_v29 }
 0x5a0   :  { %1170 = vmatprep.subr.bf16.mxu0 %v2496_v30  ;;  %1211 = vmatprep.subr.bf16.mxu1 %v2499_v31 }
 0x5a3   :  { %1171 = vmatpush1.bf16.msra.mxu0 %v2502_v32  ;;  %1212 = vmatpush1.bf16.msra.mxu1 %v2505_v33 }
 0x5a4   :  { %1172 = vmatprep.subr.bf16.mxu0 %v2508_v34  ;;  %1213 = vmatprep.subr.bf16.mxu1 %v2511_v35 }
 0x5a7   :  { %1173 = vmatpush1.bf16.msra.mxu0 %v2514_v36  ;;  %1214 = vmatpush1.bf16.msra.mxu1 %v2517_v37 }
 0x5a8   :  { %1174 = vmatprep.subr.bf16.mxu0 %v2520_v38  ;;  %1215 = vmatprep.subr.bf16.mxu1 %v2523_v39 }
 0x5ab   :  { %1175 = vmatpush1.bf16.msra.mxu0 %v2526_v40  ;;  %1216 = vmatpush1.bf16.msra.mxu1 %v2529_v41 }
 0x5ac   :  { %1176 = vmatprep.subr.bf16.mxu0 %v2957_v27  ;;  %1217 = vmatprep.subr.bf16.mxu1 %v2958_v51 }
 0x5af   :  { %1177 = vmatpush1.bf16.msra.mxu0 %v2959_v43  ;;  %1218 = vmatpush1.bf16.msra.mxu1 %v2960_v1 }
 0x5b0   :  { %1178 = vmatprep.subr.bf16.mxu0 %v2961_v6  ;;  %1219 = vmatprep.subr.bf16.mxu1 %v2962_v9 }
 0x5b3   :  { %1179 = vmatpush1.bf16.msra.mxu0 %v2963_v4  ;;  %1220 = vmatpush1.bf16.msra.mxu1 %v2964_v5  ;;  %v2975_v5 = vld [vmem:[#allocation31_spill] sm:$0xff] }
 0x5b4   :  { %1180 = vmatprep.subr.bf16.mxu0 %v2965_v8  ;;  %1221 = vmatprep.subr.bf16.mxu1 %v2966_v2  ;;  %v2976_v8 = vld [vmem:[#allocation34_spill] sm:$0xff]  ;;  %v2977_v2 = vld [vmem:[#allocation15_spill] sm:$0xff] }
 0x5b5   :  { %v2979_v4 = vld [vmem:[#allocation35_spill] sm:$0xff] }
 0x5b7   :  { %1181 = vmatpush1.bf16.msra.mxu0 %v2967_v62  ;;  %1222 = vmatpush1.bf16.msra.mxu1 %v2968_v3  ;;  %v2978_v62 = vld [vmem:[#allocation18_spill] sm:$0xff] }
 0x5b8   :  { %1182 = vmatprep.subr.bf16.mxu0 %v2969_v47  ;;  %1223 = vmatprep.subr.bf16.mxu1 %v2970_v23 }
 0x5bb   :  { %1183 = vmatpush1.bf16.msra.mxu0 %v2971_v50  ;;  %1224 = vmatpush1.bf16.msra.mxu1 %v2972_v44 }
 0x5bc   :  { %1184 = vmatprep.subr.bf16.mxu0 %v2973_v24  ;;  %1225 = vmatprep.subr.bf16.mxu1 %v2974_v46 }
 0x5bf   :  { %1185 = vmatpush1.bf16.msra.mxu0 %v2975_v5  ;;  %1226 = vmatpush1.bf16.msra.mxu1 %v2976_v8 }
 0x5c0   :  { %1270 = vmatprep.subr.bf16.mxu0 %v2977_v2  ;;  %1311 = vmatprep.subr.bf16.mxu1 %v2978_v62 }
 0x655   :  { %v1072_v3 = vpop.f32.mrb[20].mxu0  ;;  %v1113_v47 = vpop.f32.mrb[20].mxu1 }
 0x656   :  { %v1073_v23 = vadd.f32 %v1072_v3, %v2979_v4  ;;  %v1074_v9 = vpop.f32.mrb[21].mxu0  ;;  %v1115_v50 = vpop.f32.mrb[21].mxu1  ;;  %v1114_v62 = vadd.f32 %v1113_v47, %v2180_v45 }
 0x657   :  { %v1075_v44 = vadd.f32 %v1074_v9, %v2173_v61  ;;  %v1076_v6 = vpop.f32.mrb[22].mxu0  ;;  %v1117_v24 = vpop.f32.mrb[22].mxu1  ;;  %v1116_v2 = vadd.f32 %v1115_v50, %v2177_v55 }
 0x658   :  { %v1478_v1 = vmul.f32 -1.442695, %v1073_v23  ;;  %v1077_v46 = vpop.f32.mrb[23].mxu0  ;;  %v1118_v43 = vpop.f32.mrb[23].mxu1 }
 0x659   :  { %v1479_v5 = vmul.f32 -1.442695, %v1075_v44  ;;  %v1480_v8 = vmul.f32 -1.442695, %v1116_v2  ;;  %v1150_v46 = vld [vmem:[#allocation4 + $0x18] sm:$0xf] }
 0x65a   :  { %1671 = vpow2.f32 %v1478_v1 }
 0x65b   :  { %1673 = vpow2.f32 %v1479_v5 }
 0x65c   :  { %1675 = vpow2.f32 %v1480_v8 }
 0x65d   :  { %1677 = vtanh.f32 %v1114_v62 }
 0x664   :  { %v1672_v51 = vpop.eup %1671 }
 0x665   :  { %v1674_v3 = vpop.eup %1673  ;;  %v1123_v4 = vadd.f32 1.0, %v1672_v51 }
 0x666   :  { %v1129_v27 = vadd.f32 1.0, %v1674_v3  ;;  %v1676_v6 = vpop.eup %1675 }
 0x667   :  { %1679 = vrcp.f32 %v1123_v4  ;;  %v1678_v9 = vpop.eup %1677  ;;  %v1136_v43 = vadd.f32 1.0, %v1676_v6 }
 0x668   :  { %1681 = vrcp.f32 %v1129_v27 }
 0x669   :  { %1683 = vrcp.f32 %v1136_v43 }
 0x671   :  { %v1680_v23 = vpop.eup %1679 }
 0x672   :  { %v1682_v44 = vpop.eup %1681  ;;  %v1140_v1 = vmul.f32 %v1680_v23, %v1678_v9 }
 0x673   :  { %v1139_v5 = vmul.f32 %v1682_v44, %v2599_v7  ;;  %v1684_v8 = vpop.eup %1683  ;;  %v1266_v44 = vld [vmem:[#allocation4 + $0x1c] sm:$0xf] }
 0x675   :  { %v2671_v50 = vadd.f32 %v1140_v1, %v1139_v5 }
 0x677   :  { %1685 = vtanh.f32 %v2671_v50 }
 0x681   :  { %v1686_v47 = vpop.eup %1685 }
 0x682   :  { %v1143_v51 = vmul.f32 %v1686_v47, %v1684_v8 }
 0x684   :  { %v1146_v24 = vpack.c.bf16 %v1143_v51, %v1143_v51 }
 0x686   :  { %1148 = vst [vmem:[#allocation9 + $0x14] sm:$0xf] %v1146_v24  ;;  %1186 = vmatprep.mubr.bf16.mxu0 %v1146_v24  ;;  %1227 = vmatprep.mubr.bf16.mxu1 %v1146_v24 }
 0x687   :  { %1187 = vmatmul.mubr.bf16.vlgmr.msra.gmra.mrb[24].mxu0 %v1150_v46  ;;  %1228 = vmatmul.mubr.bf16.vlgmr.msra.gmra.mrb[24].mxu1 %v1150_v46 }
 0x688   :  { %1271 = vmatpush1.bf16.msra.mxu0 %v2330_v42  ;;  %1312 = vmatpush1.bf16.msra.mxu1 %v2333_v59  ;;  %v2980_v42 = vld [vmem:[#allocation16_spill] sm:$0xff]  ;;  %v2981_v59 = vld [vmem:[#allocation21_spill] sm:$0xff] }
 0x689   :  { %1272 = vmatprep.subr.bf16.mxu0 %v2336_v52  ;;  %1313 = vmatprep.subr.bf16.mxu1 %v2423_v56  ;;  %v2982_v52 = vld [vmem:[#allocation17_spill] sm:$0xff] }
 0x68a   :  { %v2987_v56 = vld [vmem:[#allocation25_spill] sm:$0xff] }
 0x68c   :  { %1273 = vmatpush1.bf16.msra.mxu0 %v2340_v57  ;;  %1314 = vmatpush1.bf16.msra.mxu1 %v2427_v60  ;;  %v2983_v57 = vld [vmem:[#allocation22_spill] sm:$0xff]  ;;  %v2988_v60 = vld [vmem:[#allocation20_spill] sm:$0xff] }
 0x68d   :  { %1274 = vmatprep.subr.bf16.mxu0 %v2344_v54  ;;  %1315 = vmatprep.subr.bf16.mxu1 %v2431_v63  ;;  %v2984_v54 = vld [vmem:[#allocation19_spill] sm:$0xff]  ;;  %v2989_v63 = vld [vmem:[#allocation26_spill] sm:$0xff] }
 0x690   :  { %1275 = vmatpush1.bf16.msra.mxu0 %v2348_v48  ;;  %1316 = vmatpush1.bf16.msra.mxu1 %v2435_v58  ;;  %v2985_v48 = vld [vmem:[#allocation13_spill] sm:$0xff]  ;;  %v2990_v58 = vld [vmem:[#allocation23_spill] sm:$0xff] }
 0x691   :  { %1276 = vmatprep.subr.bf16.mxu0 %v2352_v0  ;;  %1317 = vmatprep.subr.bf16.mxu1 %v2439_v49  ;;  %v2986_v0 = vld [vmem:[#allocation14_spill] sm:$0xff]  ;;  %v2991_v49 = vld [vmem:[#allocation29_spill] sm:$0xff] }
 0x694   :  { %1277 = vmatpush1.bf16.msra.mxu0 %v2442_v53  ;;  %1318 = vmatpush1.bf16.msra.mxu1 %v2445_v10  ;;  %v2992_v53 = vld [vmem:[#allocation24_spill] sm:$0xff]  ;;  %v2993_v10 = vld [vmem:[#allocation30_spill] sm:$0xff] }
 0x695   :  { %1278 = vmatprep.subr.bf16.mxu0 %v2448_v11  ;;  %1319 = vmatprep.subr.bf16.mxu1 %v2451_v12  ;;  %v2994_v11 = vld [vmem:[#allocation27_spill] sm:$0xff]  ;;  %v2995_v12 = vld [vmem:[#allocation32_spill] sm:$0xff] }
 0x698   :  { %1279 = vmatpush1.bf16.msra.mxu0 %v2454_v13  ;;  %1320 = vmatpush1.bf16.msra.mxu1 %v2457_v14  ;;  %v2996_v13 = vld [vmem:[#allocation28_spill] sm:$0xff]  ;;  %v2997_v14 = vld [vmem:[#allocation33_spill] sm:$0xff] }
 0x699   :  { %1280 = vmatprep.subr.bf16.mxu0 %v2460_v15  ;;  %1321 = vmatprep.subr.bf16.mxu1 %v2463_v16  ;;  %v2998_v15 = vld [vmem:[#allocation31_spill] sm:$0xff]  ;;  %v2999_v16 = vld [vmem:[#allocation34_spill] sm:$0xff] }
 0x69c   :  { %1281 = vmatpush1.bf16.msra.mxu0 %v2466_v17  ;;  %1322 = vmatpush1.bf16.msra.mxu1 %v2469_v18 }
 0x69d   :  { %1282 = vmatprep.subr.bf16.mxu0 %v2472_v19  ;;  %1323 = vmatprep.subr.bf16.mxu1 %v2475_v20  ;;  %v3000_v19 = vld [vmem:[#allocation35_spill] sm:$0xff] }
 0x6a0   :  { %1283 = vmatpush1.bf16.msra.mxu0 %v2478_v21  ;;  %1324 = vmatpush1.bf16.msra.mxu1 %v2481_v22 }
 0x6a1   :  { %1284 = vmatprep.subr.bf16.mxu0 %v2484_v25  ;;  %1325 = vmatprep.subr.bf16.mxu1 %v2487_v26 }
 0x6a4   :  { %1285 = vmatpush1.bf16.msra.mxu0 %v2490_v28  ;;  %1326 = vmatpush1.bf16.msra.mxu1 %v2493_v29 }
 0x6a5   :  { %1286 = vmatprep.subr.bf16.mxu0 %v2496_v30  ;;  %1327 = vmatprep.subr.bf16.mxu1 %v2499_v31 }
 0x6a8   :  { %1287 = vmatpush1.bf16.msra.mxu0 %v2502_v32  ;;  %1328 = vmatpush1.bf16.msra.mxu1 %v2505_v33 }
 0x6a9   :  { %1288 = vmatprep.subr.bf16.mxu0 %v2508_v34  ;;  %1329 = vmatprep.subr.bf16.mxu1 %v2511_v35 }
 0x6ac   :  { %1289 = vmatpush1.bf16.msra.mxu0 %v2514_v36  ;;  %1330 = vmatpush1.bf16.msra.mxu1 %v2517_v37 }
 0x6ad   :  { %1290 = vmatprep.subr.bf16.mxu0 %v2520_v38  ;;  %1331 = vmatprep.subr.bf16.mxu1 %v2523_v39 }
 0x6b0   :  { %1291 = vmatpush1.bf16.msra.mxu0 %v2526_v40  ;;  %1332 = vmatpush1.bf16.msra.mxu1 %v2529_v41 }
 0x6b1   :  { %1292 = vmatprep.subr.bf16.mxu0 %v2980_v42  ;;  %1333 = vmatprep.subr.bf16.mxu1 %v2981_v59 }
 0x6b4   :  { %1293 = vmatpush1.bf16.msra.mxu0 %v2982_v52  ;;  %1334 = vmatpush1.bf16.msra.mxu1 %v2983_v57 }
 0x6b5   :  { %1294 = vmatprep.subr.bf16.mxu0 %v2984_v54  ;;  %1335 = vmatprep.subr.bf16.mxu1 %v2985_v48 }
 0x6b8   :  { %1295 = vmatpush1.bf16.msra.mxu0 %v2986_v0  ;;  %1336 = vmatpush1.bf16.msra.mxu1 %v2987_v56 }
 0x6b9   :  { %1296 = vmatprep.subr.bf16.mxu0 %v2988_v60  ;;  %1337 = vmatprep.subr.bf16.mxu1 %v2989_v63 }
 0x6bc   :  { %1297 = vmatpush1.bf16.msra.mxu0 %v2990_v58  ;;  %1338 = vmatpush1.bf16.msra.mxu1 %v2991_v49 }
 0x6bd   :  { %1298 = vmatprep.subr.bf16.mxu0 %v2992_v53  ;;  %1339 = vmatprep.subr.bf16.mxu1 %v2993_v10 }
 0x6c0   :  { %1299 = vmatpush1.bf16.msra.mxu0 %v2994_v11  ;;  %1340 = vmatpush1.bf16.msra.mxu1 %v2995_v12 }
 0x6c1   :  { %1300 = vmatprep.subr.bf16.mxu0 %v2996_v13  ;;  %1341 = vmatprep.subr.bf16.mxu1 %v2997_v14 }
 0x6c4   :  { %1301 = vmatpush1.bf16.msra.mxu0 %v2998_v15  ;;  %1342 = vmatpush1.bf16.msra.mxu1 %v2999_v16 }
 0x75a   :  { %v1188_v17 = vpop.f32.mrb[24].mxu0  ;;  %v1229_v18 = vpop.f32.mrb[24].mxu1 }
 0x75b   :  { %v1189_v20 = vadd.f32 %v1188_v17, %v3000_v19  ;;  %v1190_v21 = vpop.f32.mrb[25].mxu0  ;;  %v1231_v22 = vpop.f32.mrb[25].mxu1  ;;  %v1230_v35 = vadd.f32 %v1229_v18, %v2180_v45 }
 0x75c   :  { %v1191_v25 = vadd.f32 %v1190_v21, %v2173_v61  ;;  %v1192_v26 = vpop.f32.mrb[26].mxu0  ;;  %v1233_v28 = vpop.f32.mrb[26].mxu1  ;;  %v1232_v33 = vadd.f32 %v1231_v22, %v2177_v55 }
 0x75d   :  { %v1481_v29 = vmul.f32 -1.442695, %v1189_v20  ;;  %v1193_v30 = vpop.f32.mrb[27].mxu0  ;;  %v1234_v31 = vpop.f32.mrb[27].mxu1 }
 0x75e   :  { %v1482_v32 = vmul.f32 -1.442695, %v1191_v25  ;;  %v1483_v34 = vmul.f32 -1.442695, %v1232_v33 }
 0x75f   :  { %1687 = vpow2.f32 %v1481_v29 }
 0x760   :  { %1689 = vpow2.f32 %v1482_v32 }
 0x761   :  { %1691 = vpow2.f32 %v1483_v34 }
 0x762   :  { %1693 = vtanh.f32 %v1230_v35 }
 0x769   :  { %v1688_v36 = vpop.eup %1687 }
 0x76a   :  { %v1690_v37 = vpop.eup %1689  ;;  %v1239_v38 = vadd.f32 1.0, %v1688_v36 }
 0x76b   :  { %v1245_v39 = vadd.f32 1.0, %v1690_v37  ;;  %v1692_v40 = vpop.eup %1691 }
 0x76c   :  { %1695 = vrcp.f32 %v1239_v38  ;;  %v1694_v41 = vpop.eup %1693  ;;  %v1252_v27 = vadd.f32 1.0, %v1692_v40 }
 0x76d   :  { %1697 = vrcp.f32 %v1245_v39 }
 0x76e   :  { %1699 = vrcp.f32 %v1252_v27 }
 0x776   :  { %v1696_v7 = vpop.eup %1695 }
 0x777   :  { %v1698_v4 = vpop.eup %1697  ;;  %v1256_v2 = vmul.f32 %v1696_v7, %v1694_v41 }
 0x778   :  { %v1255_v62 = vmul.f32 %v1698_v4, %v2671_v50  ;;  %v1700_v6 = vpop.eup %1699 }
 0x77a   :  { %v1257_v3 = vadd.f32 %v1256_v2, %v1255_v62 }
 0x77c   :  { %1701 = vtanh.f32 %v1257_v3 }
 0x786   :  { %v1702_v9 = vpop.eup %1701 }
 0x787   :  { %v1259_v23 = vmul.f32 %v1702_v9, %v1700_v6 }
 0x789   :  { %v1262_v43 = vpack.c.bf16 %v1259_v23, %v1259_v23 }
 0x78b   :  { %1264 = vst [vmem:[#allocation9 + $0x18] sm:$0xf] %v1262_v43  ;;  %1302 = vmatprep.mubr.bf16.mxu0 %v1262_v43  ;;  %1343 = vmatprep.mubr.bf16.mxu1 %v1262_v43 }
 0x78c   :  { %1303 = vmatmul.mubr.bf16.vlgmr.msra.gmra.mrb[28].mxu0 %v1266_v44  ;;  %1344 = vmatmul.mubr.bf16.vlgmr.msra.gmra.mrb[28].mxu1 %v1266_v44 }
 0x85f   :  { %v1304_v1 = vpop.f32.mrb[28].mxu0  ;;  %v1345_v5 = vpop.f32.mrb[28].mxu1 }
 0x860   :  { %v1305_v8 = vadd.f32 %v1304_v1, %v3000_v19  ;;  %v1306_v47 = vpop.f32.mrb[29].mxu0  ;;  %v1347_v51 = vpop.f32.mrb[29].mxu1  ;;  %v1346_v0 = vadd.f32 %v1345_v5, %v2180_v45 }
 0x861   :  { %v1307_v50 = vadd.f32 %v1306_v47, %v2173_v61  ;;  %v1308_v24 = vpop.f32.mrb[30].mxu0  ;;  %v1349_v46 = vpop.f32.mrb[30].mxu1  ;;  %v1348_v54 = vadd.f32 %v1347_v51, %v2177_v55 }
 0x862   :  { %v1484_v42 = vmul.f32 -1.442695, %v1305_v8  ;;  %v1309_v59 = vpop.f32.mrb[31].mxu0  ;;  %v1350_v52 = vpop.f32.mrb[31].mxu1 }
 0x863   :  { %v1485_v57 = vmul.f32 -1.442695, %v1307_v50  ;;  %v1486_v48 = vmul.f32 -1.442695, %v1348_v54 }
 0x864   :  { %1703 = vpow2.f32 %v1484_v42 }
 0x865   :  { %1705 = vpow2.f32 %v1485_v57 }
 0x866   :  { %1707 = vpow2.f32 %v1486_v48 }
 0x867   :  { %1709 = vtanh.f32 %v1346_v0 }
 0x86e   :  { %v1704_v56 = vpop.eup %1703 }
 0x86f   :  { %v1706_v60 = vpop.eup %1705  ;;  %v1355_v63 = vadd.f32 1.0, %v1704_v56 }
 0x870   :  { %v1361_v58 = vadd.f32 1.0, %v1706_v60  ;;  %v1708_v61 = vpop.eup %1707 }
 0x871   :  { %1711 = vrcp.f32 %v1355_v63  ;;  %v1710_v49 = vpop.eup %1709  ;;  %v1368_v10 = vadd.f32 1.0, %v1708_v61 }
 0x872   :  { %1713 = vrcp.f32 %v1361_v58 }
 0x873   :  { %1715 = vrcp.f32 %v1368_v10 }
 0x87b   :  { %v1712_v53 = vpop.eup %1711 }
 0x87c   :  { %v1714_v11 = vpop.eup %1713  ;;  %v1372_v12 = vmul.f32 %v1712_v53, %v1710_v49 }
 0x87d   :  { %v1371_v13 = vmul.f32 %v1714_v11, %v1257_v3  ;;  %v1716_v55 = vpop.eup %1715 }
 0x87f   :  { %v1373_v14 = vadd.f32 %v1372_v12, %v1371_v13 }
 0x881   :  { %1717 = vtanh.f32 %v1373_v14 }
 0x88b   :  { %v1718_v45 = vpop.eup %1717 }
 0x88c   :  { %v1375_v15 = vmul.f32 %v1718_v45, %v1716_v55 }
 0x88e   :  { %v1378_v16 = vpack.c.bf16 %v1375_v15, %v1375_v15 }
 0x890   :  { %1380 = vst [vmem:[#allocation9 + $0x1c] sm:$0xf] %v1378_v16 }
 0x891   :  { %1838 = shalt.err (!%p1835_p6)
}
 0x892   :  { %s1839_s17 = scalar_lea.hbm %s2763_s3, 512 }
 0x893   :  { %p1840_p7 = scmp.ne.s32.totalorder %s2763_s3, %s1839_s17  ;;  %p1843_p8 = scmp.lt.u32.totalorder %s1839_s17, %s2763_s3 }
 0x895   :  { %p1845_p9 = pnand %p1843_p8, %p1840_p7 }
 0x897   :  { %1848 = shalt.err (!%p1845_p9)
}
 0x898   :  { %1392 = dma.vmem_to_hbm [thread:$0]  %s1387_s13, 512, %s2763_s3, [#allocation6], %s1856_s22, %s1856_s22, %s1857_s23  }
 0x899   :  { %1853 = dma.done.wait [#allocation6], 512  }
 0x89a   :  { %1854 = vsyncadd [#allocation6], 4294966784 }
 0x89b   :  { %1396 = vsyncpa [#allocation5], 1 }
 0x89c   :  { %1397 = vsyncpa [#allocation8], 1 }
 0x89d   :  { %1398 = vsyncpa [#allocation6], 1 }

</bundles_post_ra>
